<compile_context>
chip_gen: v5e
topology: v5e:2x2
jax: 0.10.0
libtpu: 0.0.40
codegen_flags: <defaults>
</compile_context>

<pallas_src>
import jax
import jax.numpy as jnp
from jax.experimental import pallas as pl
from jax.experimental.pallas import tpu as pltpu

LANE = 128


def _round_up(n, m):
    return (n + m - 1) // m * m


# ----------------------------- fused forward kernel --------------------------
def fused_pairwise_kernel(x0_ref, x1_ref,                           # (S, D) last GRU-batch row of each side
                          wx0_ref, wh0_ref, ba0_ref, bhn0_ref,      # GRU layer 0 (gate-concat, lane-padded)
                          wx1_ref, wh1_ref, ba1_ref, bhn1_ref,      # GRU layer 1
                          w1_ref, b1_ref, w2_ref, b2_ref,           # FC head
                          o_ref,                                    # (S, out_dim)
                          xg0_ref, xg1_ref,                         # VMEM scratch (S, 3*Hp) each
                          y_ref):                                   # VMEM scratch (S, 2, Hp)
    S = x0_ref.shape[0]
    Hp = wh0_ref.shape[0]

    # Hoist weight / bias loads out of the serial recurrence (loaded once).
    wh0 = wh0_ref[...]; bhn0 = bhn0_ref[...]
    wx1 = wx1_ref[...]; wh1 = wh1_ref[...]; ba1 = ba1_ref[...]; bhn1 = bhn1_ref[...]

    # Layer-0 input projection has NO recurrent dependence: one well-occupied matmul
    # per side before the loop (removes 1 of 4 matmuls from the serial chain).
    wx0 = wx0_ref[...]; ba0 = ba0_ref[...]
    xg0_ref[...] = jnp.dot(x0_ref[...], wx0, preferred_element_type=jnp.float32) + ba0
    xg1_ref[...] = jnp.dot(x1_ref[...], wx0, preferred_element_type=jnp.float32) + ba0

    def gru_gates(xg, hg, h, bhn):
        # PyTorch gate order (r, z, n); each gate padded to Hp lanes so slices fall on
        # lane-128 boundaries. Pad lanes provably stay 0 (zero-padded weights/biases).
        r = jax.nn.sigmoid(xg[:, 0 * Hp:1 * Hp] + hg[:, 0 * Hp:1 * Hp])
        z = jax.nn.sigmoid(xg[:, 1 * Hp:2 * Hp] + hg[:, 1 * Hp:2 * Hp])
        n = jnp.tanh(xg[:, 2 * Hp:3 * Hp] + r * (hg[:, 2 * Hp:3 * Hp] + bhn))
        return (1.0 - z) * n + z * h

    def step(t, carry):
        h0, h1 = carry
        # Precomputed layer-0 pre-activations for step t (both sides); this load+merge
        # does not depend on h, so it sits off the recurrent critical path.
        xg_t = jnp.concatenate(
            [xg0_ref[pl.ds(t, 1), :], xg1_ref[pl.ds(t, 1), :]], axis=0)      # (2, 3Hp)
        # Layer 0: only the h-side matmul remains inside the loop.
        hg0 = jnp.dot(h0, wh0, preferred_element_type=jnp.float32)
        h0 = gru_gates(xg_t, hg0, h0, bhn0)
        # Layer 1: its input projection depends on h0, so it stays in the loop.
        xg1c = jnp.dot(h0, wx1, preferred_element_type=jnp.float32) + ba1
        hg1 = jnp.dot(h1, wh1, preferred_element_type=jnp.float32)
        h1 = gru_gates(xg1c, hg1, h1, bhn1)
        y_ref[t] = h1                                       # (2, Hp) layer-1 state stays in VMEM
        return h0, h1

    h_init = jnp.zeros((2, Hp), jnp.float32)                # PyTorch zero initial state
    unroll = True if S <= 16 else 8                         # avoid code-size blowup at large S
    jax.lax.fori_loop(0, S, step, (h_init, h_init), unroll=unroll)

    # Head (Dropout -> Linear(H,10) -> ReLU -> Dropout -> Linear(10,out); dropout = identity),
    # batched over both sides: one matmul per layer on (2S, Hp) instead of two S-row ones.
    y_all = y_ref[...]                                      # (S, 2, Hp)
    ycat = jnp.concatenate([y_all[:, 0, :], y_all[:, 1, :]], axis=0)         # (2S, Hp)
    hid = jnp.maximum(
        jnp.dot(ycat, w1_ref[...], preferred_element_type=jnp.float32) + b1_ref[...], 0.0)
    logits = jnp.dot(hid, w2_ref[...], preferred_element_type=jnp.float32) + b2_ref[...]
    o_ref[...] = jax.nn.sigmoid(logits[:S, :] - logits[S:, :])


# ------------------------------ parameter packing ----------------------------
def _pack_gru_layer(wih, whh, bih, bhh, in_pad, Hp):
    """wih:(3,Din,H) whh:(3,H,H) bih/bhh:(3,1,H)  ->  gate-concat, lane-padded operands."""
    _, in_dim, H = wih.shape
    wx = jnp.zeros((in_pad, 3 * Hp), jnp.float32)
    wh = jnp.zeros((Hp, 3 * Hp), jnp.float32)
    ba = jnp.zeros((1, 3 * Hp), jnp.float32)
    bhn = jnp.zeros((1, Hp), jnp.float32)
    for g in range(3):
        wx = wx.at[:in_dim, g * Hp:g * Hp + H].set(wih[g])
        wh = wh.at[:H, g * Hp:g * Hp + H].set(whh[g])
    ba = ba.at[:, 0 * Hp:0 * Hp + H].set(bih[0] + bhh[0])    # r: pre-summed biases
    ba = ba.at[:, 1 * Hp:1 * Hp + H].set(bih[1] + bhh[1])    # z: pre-summed biases
    ba = ba.at[:, 2 * Hp:2 * Hp + H].set(bih[2])             # n: x-side bias only
    bhn = bhn.at[:, :H].set(bhh[2])                          # n: h-side bias (inside r*(...))
    return wx, wh, ba, bhn


def pack_params(params):
    """Run ONCE at init; the result is passed to every forward call (no per-call packing)."""
    H = params["whh0"].shape[-1]
    D = params["wih0"].shape[1]
    Hp = _round_up(H, LANE)
    wx0, wh0, ba0, bhn0 = _pack_gru_layer(params["wih0"], params["whh0"],
                                          params["bih0"], params["bhh0"], D, Hp)
    wx1, wh1, ba1, bhn1 = _pack_gru_layer(params["wih1"], params["whh1"],
                                          params["bih1"], params["bhh1"], Hp, Hp)
    w1p = jnp.zeros((Hp, params["w1"].shape[1]), jnp.float32).at[:H].set(params["w1"])
    packed = {"wx0": wx0, "wh0": wh0, "ba0": ba0, "bhn0": bhn0,
              "wx1": wx1, "wh1": wh1, "ba1": ba1, "bhn1": bhn1,
              "w1": w1p, "b1": params["b1"], "w2": params["w2"], "b2": params["b2"]}
    return packed


# ---------------------------------- forward ----------------------------------
@jax.jit
def pairwise_forward(packed, x0, x1):
    # x0/x1: (D0, D1, input_dim). GRU (batch_first=False) => D0 = time, D1 = GRU batch.
    # out[:, -1, :] only ever reads GRU-batch row D1-1 of each side, so slice it here:
    # the recurrence then runs on just 2 batch rows (x0-side, x1-side).
    S = x0.shape[0]
    Hp = packed["wh0"].shape[0]
    G = packed["wx0"].shape[1]
    out_dim = packed["w2"].shape[1]
    x0_last = x0[:, -1, :]                                  # (S, D)
    x1_last = x1[:, -1, :]                                  # (S, D)
    return pl.pallas_call(
        fused_pairwise_kernel,
        out_shape=jax.ShapeDtypeStruct((S, out_dim), jnp.float32),
        scratch_shapes=[
            pltpu.VMEM((S, G), jnp.float32),                # hoisted layer-0 preacts, x0 side
            pltpu.VMEM((S, G), jnp.float32),                # hoisted layer-0 preacts, x1 side
            pltpu.VMEM((S, 2, Hp), jnp.float32),            # layer-1 states (2 rows only)
        ],
    )(x0_last, x1_last,
      packed["wx0"], packed["wh0"], packed["ba0"], packed["bhn0"],
      packed["wx1"], packed["wh1"], packed["ba1"], packed["bhn1"],
      packed["w1"], packed["b1"], packed["w2"], packed["b2"])


# --------------------------------- parameters ---------------------------------
def init_params(key, input_dim, hidden_size, output_dim):
    ks = jax.random.split(key, 12)

    def u(kk, shape, bound):
        return jax.random.uniform(kk, shape, jnp.float32, -bound, bound)

    k = 1.0 / float(hidden_size) ** 0.5
    params = {
        # GRU layer 0 (input -> hidden), stored transposed: (gate, in, H), gate order (r,z,n)
        "wih0": u(ks[0], (3, input_dim, hidden_size), k),
        "whh0": u(ks[1], (3, hidden_size, hidden_size), k),
        "bih0": u(ks[2], (3, 1, hidden_size), k),
        "bhh0": u(ks[3], (3, 1, hidden_size), k),
        # GRU layer 1 (hidden -> hidden)
        "wih1": u(ks[4], (3, hidden_size, hidden_size), k),
        "whh1": u(ks[5], (3, hidden_size, hidden_size), k),
        "bih1": u(ks[6], (3, 1, hidden_size), k),
        "bhh1": u(ks[7], (3, 1, hidden_size), k),
    }
    k1 = 1.0 / float(hidden_size) ** 0.5
    params["w1"] = u(ks[8], (hidden_size, 10), k1)
    params["b1"] = u(ks[9], (1, 10), k1)
    k2 = 1.0 / float(10) ** 0.5
    params["w2"] = u(ks[10], (10, output_dim), k2)
    params["b2"] = u(ks[11], (1, output_dim), k2)
    return params


# ---------------------------- pure-JAX reference ------------------------------
# Runs the GRU over the FULL (D0, D1, D) input (all batch rows), exactly like the
# PyTorch module, so it also validates the last-row slicing optimization.
def gru_layer_ref(x, wih, whh, bih, bhh):
    B = x.shape[1]
    H = whh.shape[-1]

    def step(h, x_t):
        r = jax.nn.sigmoid(x_t @ wih[0] + bih[0] + h @ whh[0] + bhh[0])
        z = jax.nn.sigmoid(x_t @ wih[1] + bih[1] + h @ whh[1] + bhh[1])
        n = jnp.tanh(x_t @ wih[2] + bih[2] + r * (h @ whh[2] + bhh[2]))
        h_new = (1.0 - z) * n + z * h
        return h_new, h_new

    _, outs = jax.lax.scan(step, jnp.zeros((B, H), jnp.float32), x)
    return outs


def pairwise_forward_ref(params, x0, x1):
    def run(x):
        h = gru_layer_ref(x, params["wih0"], params["whh0"], params["bih0"], params["bhh0"])
        h = gru_layer_ref(h, params["wih1"], params["whh1"], params["bih1"], params["bhh1"])
        y = h[:, -1, :]
        y = jnp.maximum(y @ params["w1"] + params["b1"], 0.0)
        return y @ params["w2"] + params["b2"]

    return jax.nn.sigmoid(run(x0) - run(x1))


if __name__ == "__main__":
    input_dim, sequence_len, hidden_size, output_dim = 4, 8, 32, 1
    batch = 2

    key = jax.random.PRNGKey(0)
    kp, k0, k1 = jax.random.split(key, 3)
    params = init_params(kp, input_dim, hidden_size, output_dim)
    packed = pack_params(params)                       # weights packed ONCE, outside the call path

    x0 = jax.random.normal(k0, (batch, sequence_len, input_dim), jnp.float32)
    x1 = jax.random.normal(k1, (batch, sequence_len, input_dim), jnp.float32)

    prob = jax.block_until_ready(pairwise_forward(packed, x0, x1))
    assert prob.shape == (batch, output_dim), prob.shape

    ref = pairwise_forward_ref(params, x0, x1)
    assert jnp.allclose(prob, ref, rtol=1e-4, atol=1e-4), (prob, ref)

    print("KERNEL_OK")
</pallas_src>

<mosaic_0001>
module attributes {stable_mosaic.version = 11 : i64} {
  func.func @fused_pairwise_kernel(%arg0: memref<2x4xf32, #tpu.memory_space<vmem>>, %arg1: memref<2x4xf32, #tpu.memory_space<vmem>>, %arg2: memref<4x384xf32, #tpu.memory_space<vmem>>, %arg3: memref<128x384xf32, #tpu.memory_space<vmem>>, %arg4: memref<1x384xf32, #tpu.memory_space<vmem>>, %arg5: memref<1x128xf32, #tpu.memory_space<vmem>>, %arg6: memref<128x384xf32, #tpu.memory_space<vmem>>, %arg7: memref<128x384xf32, #tpu.memory_space<vmem>>, %arg8: memref<1x384xf32, #tpu.memory_space<vmem>>, %arg9: memref<1x128xf32, #tpu.memory_space<vmem>>, %arg10: memref<128x10xf32, #tpu.memory_space<vmem>>, %arg11: memref<1x10xf32, #tpu.memory_space<vmem>>, %arg12: memref<10x1xf32, #tpu.memory_space<vmem>>, %arg13: memref<1x1xf32, #tpu.memory_space<vmem>>, %arg14: memref<2x1xf32, #tpu.memory_space<vmem>>, %arg15: memref<2x384xf32, #tpu.memory_space<vmem>>, %arg16: memref<2x384xf32, #tpu.memory_space<vmem>>, %arg17: memref<2x2x128xf32, #tpu.memory_space<vmem>>) attributes {dimension_semantics = [], scalar_prefetch = 0 : i64, scratch_operands = 3 : i64, tpu.core_type = #tpu.core_type<tc>} {
    %c0 = arith.constant 0 : index
    %c0_0 = arith.constant 0 : index
    %0 = vector.load %arg3[%c0, %c0_0] : memref<128x384xf32, #tpu.memory_space<vmem>>, vector<128x384xf32>
    %c0_1 = arith.constant 0 : index
    %c0_2 = arith.constant 0 : index
    %1 = vector.load %arg5[%c0_1, %c0_2] : memref<1x128xf32, #tpu.memory_space<vmem>>, vector<1x128xf32>
    %c0_3 = arith.constant 0 : index
    %c0_4 = arith.constant 0 : index
    %2 = vector.load %arg6[%c0_3, %c0_4] : memref<128x384xf32, #tpu.memory_space<vmem>>, vector<128x384xf32>
    %c0_5 = arith.constant 0 : index
    %c0_6 = arith.constant 0 : index
    %3 = vector.load %arg7[%c0_5, %c0_6] : memref<128x384xf32, #tpu.memory_space<vmem>>, vector<128x384xf32>
    %c0_7 = arith.constant 0 : index
    %c0_8 = arith.constant 0 : index
    %4 = vector.load %arg8[%c0_7, %c0_8] : memref<1x384xf32, #tpu.memory_space<vmem>>, vector<1x384xf32>
    %c0_9 = arith.constant 0 : index
    %c0_10 = arith.constant 0 : index
    %5 = vector.load %arg9[%c0_9, %c0_10] : memref<1x128xf32, #tpu.memory_space<vmem>>, vector<1x128xf32>
    %c0_11 = arith.constant 0 : index
    %c0_12 = arith.constant 0 : index
    %6 = vector.load %arg2[%c0_11, %c0_12] : memref<4x384xf32, #tpu.memory_space<vmem>>, vector<4x384xf32>
    %c0_13 = arith.constant 0 : index
    %c0_14 = arith.constant 0 : index
    %7 = vector.load %arg4[%c0_13, %c0_14] : memref<1x384xf32, #tpu.memory_space<vmem>>, vector<1x384xf32>
    %c0_15 = arith.constant 0 : index
    %c0_16 = arith.constant 0 : index
    %8 = vector.load %arg0[%c0_15, %c0_16] : memref<2x4xf32, #tpu.memory_space<vmem>>, vector<2x4xf32>
    %cst = arith.constant dense<0.000000e+00> : vector<2x384xf32>
    %9 = tpu.matmul %8, %6, %cst {dimension_numbers = #tpu.dot_dimension_numbers<[1], [0], [0], [1], [0, 0, 1, 1], [], []>} : vector<2x4xf32>, vector<4x384xf32>, vector<2x384xf32> -> vector<2x384xf32>
    %10 = vector.broadcast %7 : vector<1x384xf32> to vector<2x384xf32>
    %11 = arith.addf %9, %10 : vector<2x384xf32>
    %c0_17 = arith.constant 0 : index
    %c0_18 = arith.constant 0 : index
    %12 = vector.load %arg15[%c0_17, %c0_18] : memref<2x384xf32, #tpu.memory_space<vmem>>, vector<2x384xf32>
    tpu.vector_store %arg15[%c0_17, %c0_18], %11 {strides = array<i32>} : memref<2x384xf32, #tpu.memory_space<vmem>>, vector<2x384xf32>,
    %c0_19 = arith.constant 0 : index
    %c0_20 = arith.constant 0 : index
    %13 = vector.load %arg1[%c0_19, %c0_20] : memref<2x4xf32, #tpu.memory_space<vmem>>, vector<2x4xf32>
    %cst_21 = arith.constant dense<0.000000e+00> : vector<2x384xf32>
    %14 = tpu.matmul %13, %6, %cst_21 {dimension_numbers = #tpu.dot_dimension_numbers<[1], [0], [0], [1], [0, 0, 1, 1], [], []>} : vector<2x4xf32>, vector<4x384xf32>, vector<2x384xf32> -> vector<2x384xf32>
    %15 = vector.broadcast %7 : vector<1x384xf32> to vector<2x384xf32>
    %16 = arith.addf %14, %15 : vector<2x384xf32>
    %c0_22 = arith.constant 0 : index
    %c0_23 = arith.constant 0 : index
    %17 = vector.load %arg16[%c0_22, %c0_23] : memref<2x384xf32, #tpu.memory_space<vmem>>, vector<2x384xf32>
    tpu.vector_store %arg16[%c0_22, %c0_23], %16 {strides = array<i32>} : memref<2x384xf32, #tpu.memory_space<vmem>>, vector<2x384xf32>,
    %cst_24 = arith.constant 0.000000e+00 : f32
    %18 = vector.broadcast %cst_24 : f32 to vector<2x128xf32>
    %c0_i32 = arith.constant 0 : i32
    %19 = arith.index_cast %c0_i32 : i32 to index
    %c0_25 = arith.constant 0 : index
    %20 = vector.load %arg15[%19, %c0_25] : memref<2x384xf32, #tpu.memory_space<vmem>>, vector<1x384xf32>
    %21 = arith.index_cast %c0_i32 : i32 to index
    %c0_26 = arith.constant 0 : index
    %22 = vector.load %arg16[%21, %c0_26] : memref<2x384xf32, #tpu.memory_space<vmem>>, vector<1x384xf32>
    %23 = tpu.concatenate %20, %22 in 0 : vector<1x384xf32>, vector<1x384xf32> -> vector<2x384xf32>
    %cst_27 = arith.constant dense<0.000000e+00> : vector<2x384xf32>
    %24 = tpu.matmul %18, %0, %cst_27 {dimension_numbers = #tpu.dot_dimension_numbers<[1], [0], [0], [1], [0, 0, 1, 1], [], []>} : vector<2x128xf32>, vector<128x384xf32>, vector<2x384xf32> -> vector<2x384xf32>
    %25 = vector.extract_strided_slice %23 {offsets = [0, 0], sizes = [2, 128], strides = [1, 1]} : vector<2x384xf32> to vector<2x128xf32>
    %26 = vector.extract_strided_slice %24 {offsets = [0, 0], sizes = [2, 128], strides = [1, 1]} : vector<2x384xf32> to vector<2x128xf32>
    %27 = arith.addf %25, %26 : vector<2x128xf32>
    %28 = arith.negf %27 : vector<2x128xf32>
    %29 = math.exp %28 : vector<2x128xf32>
    %cst_28 = arith.constant 1.000000e+00 : f32
    %30 = vector.broadcast %cst_28 : f32 to vector<2x128xf32>
    %31 = arith.addf %30, %29 : vector<2x128xf32>
    %32 = arith.divf %30, %31 : vector<2x128xf32>
    %33 = vector.extract_strided_slice %23 {offsets = [0, 128], sizes = [2, 128], strides = [1, 1]} : vector<2x384xf32> to vector<2x128xf32>
    %34 = vector.extract_strided_slice %24 {offsets = [0, 128], sizes = [2, 128], strides = [1, 1]} : vector<2x384xf32> to vector<2x128xf32>
    %35 = arith.addf %33, %34 : vector<2x128xf32>
    %36 = arith.negf %35 : vector<2x128xf32>
    %37 = math.exp %36 : vector<2x128xf32>
    %cst_29 = arith.constant 1.000000e+00 : f32
    %38 = vector.broadcast %cst_29 : f32 to vector<2x128xf32>
    %39 = arith.addf %38, %37 : vector<2x128xf32>
    %40 = arith.divf %38, %39 : vector<2x128xf32>
    %41 = vector.extract_strided_slice %23 {offsets = [0, 256], sizes = [2, 128], strides = [1, 1]} : vector<2x384xf32> to vector<2x128xf32>
    %42 = vector.extract_strided_slice %24 {offsets = [0, 256], sizes = [2, 128], strides = [1, 1]} : vector<2x384xf32> to vector<2x128xf32>
    %43 = vector.broadcast %1 : vector<1x128xf32> to vector<2x128xf32>
    %44 = arith.addf %42, %43 : vector<2x128xf32>
    %45 = arith.mulf %32, %44 : vector<2x128xf32>
    %46 = arith.addf %41, %45 : vector<2x128xf32>
    %47 = math.tanh %46 : vector<2x128xf32>
    %cst_30 = arith.constant 1.000000e+00 : f32
    %48 = vector.broadcast %cst_30 : f32 to vector<2x128xf32>
    %49 = arith.subf %48, %40 : vector<2x128xf32>
    %50 = arith.mulf %49, %47 : vector<2x128xf32>
    %51 = arith.mulf %40, %18 : vector<2x128xf32>
    %52 = arith.addf %50, %51 : vector<2x128xf32>
    %cst_31 = arith.constant dense<0.000000e+00> : vector<2x384xf32>
    %53 = tpu.matmul %52, %2, %cst_31 {dimension_numbers = #tpu.dot_dimension_numbers<[1], [0], [0], [1], [0, 0, 1, 1], [], []>} : vector<2x128xf32>, vector<128x384xf32>, vector<2x384xf32> -> vector<2x384xf32>
    %54 = vector.broadcast %4 : vector<1x384xf32> to vector<2x384xf32>
    %55 = arith.addf %53, %54 : vector<2x384xf32>
    %cst_32 = arith.constant dense<0.000000e+00> : vector<2x384xf32>
    %56 = tpu.matmul %18, %3, %cst_32 {dimension_numbers = #tpu.dot_dimension_numbers<[1], [0], [0], [1], [0, 0, 1, 1], [], []>} : vector<2x128xf32>, vector<128x384xf32>, vector<2x384xf32> -> vector<2x384xf32>
    %57 = vector.extract_strided_slice %55 {offsets = [0, 0], sizes = [2, 128], strides = [1, 1]} : vector<2x384xf32> to vector<2x128xf32>
    %58 = vector.extract_strided_slice %56 {offsets = [0, 0], sizes = [2, 128], strides = [1, 1]} : vector<2x384xf32> to vector<2x128xf32>
    %59 = arith.addf %57, %58 : vector<2x128xf32>
    %60 = arith.negf %59 : vector<2x128xf32>
    %61 = math.exp %60 : vector<2x128xf32>
    %cst_33 = arith.constant 1.000000e+00 : f32
    %62 = vector.broadcast %cst_33 : f32 to vector<2x128xf32>
    %63 = arith.addf %62, %61 : vector<2x128xf32>
    %64 = arith.divf %62, %63 : vector<2x128xf32>
    %65 = vector.extract_strided_slice %55 {offsets = [0, 128], sizes = [2, 128], strides = [1, 1]} : vector<2x384xf32> to vector<2x128xf32>
    %66 = vector.extract_strided_slice %56 {offsets = [0, 128], sizes = [2, 128], strides = [1, 1]} : vector<2x384xf32> to vector<2x128xf32>
    %67 = arith.addf %65, %66 : vector<2x128xf32>
    %68 = arith.negf %67 : vector<2x128xf32>
    %69 = math.exp %68 : vector<2x128xf32>
    %cst_34 = arith.constant 1.000000e+00 : f32
    %70 = vector.broadcast %cst_34 : f32 to vector<2x128xf32>
    %71 = arith.addf %70, %69 : vector<2x128xf32>
    %72 = arith.divf %70, %71 : vector<2x128xf32>
    %73 = vector.extract_strided_slice %55 {offsets = [0, 256], sizes = [2, 128], strides = [1, 1]} : vector<2x384xf32> to vector<2x128xf32>
    %74 = vector.extract_strided_slice %56 {offsets = [0, 256], sizes = [2, 128], strides = [1, 1]} : vector<2x384xf32> to vector<2x128xf32>
    %75 = vector.broadcast %5 : vector<1x128xf32> to vector<2x128xf32>
    %76 = arith.addf %74, %75 : vector<2x128xf32>
    %77 = arith.mulf %64, %76 : vector<2x128xf32>
    %78 = arith.addf %73, %77 : vector<2x128xf32>
    %79 = math.tanh %78 : vector<2x128xf32>
    %cst_35 = arith.constant 1.000000e+00 : f32
    %80 = vector.broadcast %cst_35 : f32 to vector<2x128xf32>
    %81 = arith.subf %80, %72 : vector<2x128xf32>
    %82 = arith.mulf %81, %79 : vector<2x128xf32>
    %83 = arith.mulf %72, %18 : vector<2x128xf32>
    %84 = arith.addf %82, %83 : vector<2x128xf32>
    %85 = arith.index_cast %c0_i32 : i32 to index
    %c0_36 = arith.constant 0 : index
    %c0_37 = arith.constant 0 : index
    %86 = vector.load %arg17[%85, %c0_36, %c0_37] : memref<2x2x128xf32, #tpu.memory_space<vmem>>, vector<1x2x128xf32>
    %87 = vector.shape_cast %86 : vector<1x2x128xf32> to vector<2x128xf32>
    %88 = vector.shape_cast %84 : vector<2x128xf32> to vector<1x2x128xf32>
    tpu.vector_store %arg17[%85, %c0_36, %c0_37], %88 {strides = array<i32>} : memref<2x2x128xf32, #tpu.memory_space<vmem>>, vector<1x2x128xf32>,
    %c1_i32 = arith.constant 1 : i32
    %89 = arith.index_cast %c1_i32 : i32 to index
    %c0_38 = arith.constant 0 : index
    %90 = vector.load %arg15[%89, %c0_38] : memref<2x384xf32, #tpu.memory_space<vmem>>, vector<1x384xf32>
    %91 = arith.index_cast %c1_i32 : i32 to index
    %c0_39 = arith.constant 0 : index
    %92 = vector.load %arg16[%91, %c0_39] : memref<2x384xf32, #tpu.memory_space<vmem>>, vector<1x384xf32>
    %93 = tpu.concatenate %90, %92 in 0 : vector<1x384xf32>, vector<1x384xf32> -> vector<2x384xf32>
    %cst_40 = arith.constant dense<0.000000e+00> : vector<2x384xf32>
    %94 = tpu.matmul %52, %0, %cst_40 {dimension_numbers = #tpu.dot_dimension_numbers<[1], [0], [0], [1], [0, 0, 1, 1], [], []>} : vector<2x128xf32>, vector<128x384xf32>, vector<2x384xf32> -> vector<2x384xf32>
    %95 = vector.extract_strided_slice %93 {offsets = [0, 0], sizes = [2, 128], strides = [1, 1]} : vector<2x384xf32> to vector<2x128xf32>
    %96 = vector.extract_strided_slice %94 {offsets = [0, 0], sizes = [2, 128], strides = [1, 1]} : vector<2x384xf32> to vector<2x128xf32>
    %97 = arith.addf %95, %96 : vector<2x128xf32>
    %98 = arith.negf %97 : vector<2x128xf32>
    %99 = math.exp %98 : vector<2x128xf32>
    %cst_41 = arith.constant 1.000000e+00 : f32
    %100 = vector.broadcast %cst_41 : f32 to vector<2x128xf32>
    %101 = arith.addf %100, %99 : vector<2x128xf32>
    %102 = arith.divf %100, %101 : vector<2x128xf32>
    %103 = vector.extract_strided_slice %93 {offsets = [0, 128], sizes = [2, 128], strides = [1, 1]} : vector<2x384xf32> to vector<2x128xf32>
    %104 = vector.extract_strided_slice %94 {offsets = [0, 128], sizes = [2, 128], strides = [1, 1]} : vector<2x384xf32> to vector<2x128xf32>
    %105 = arith.addf %103, %104 : vector<2x128xf32>
    %106 = arith.negf %105 : vector<2x128xf32>
    %107 = math.exp %106 : vector<2x128xf32>
    %cst_42 = arith.constant 1.000000e+00 : f32
    %108 = vector.broadcast %cst_42 : f32 to vector<2x128xf32>
    %109 = arith.addf %108, %107 : vector<2x128xf32>
    %110 = arith.divf %108, %109 : vector<2x128xf32>
    %111 = vector.extract_strided_slice %93 {offsets = [0, 256], sizes = [2, 128], strides = [1, 1]} : vector<2x384xf32> to vector<2x128xf32>
    %112 = vector.extract_strided_slice %94 {offsets = [0, 256], sizes = [2, 128], strides = [1, 1]} : vector<2x384xf32> to vector<2x128xf32>
    %113 = vector.broadcast %1 : vector<1x128xf32> to vector<2x128xf32>
    %114 = arith.addf %112, %113 : vector<2x128xf32>
    %115 = arith.mulf %102, %114 : vector<2x128xf32>
    %116 = arith.addf %111, %115 : vector<2x128xf32>
    %117 = math.tanh %116 : vector<2x128xf32>
    %cst_43 = arith.constant 1.000000e+00 : f32
    %118 = vector.broadcast %cst_43 : f32 to vector<2x128xf32>
    %119 = arith.subf %118, %110 : vector<2x128xf32>
    %120 = arith.mulf %119, %117 : vector<2x128xf32>
    %121 = arith.mulf %110, %52 : vector<2x128xf32>
    %122 = arith.addf %120, %121 : vector<2x128xf32>
    %cst_44 = arith.constant dense<0.000000e+00> : vector<2x384xf32>
    %123 = tpu.matmul %122, %2, %cst_44 {dimension_numbers = #tpu.dot_dimension_numbers<[1], [0], [0], [1], [0, 0, 1, 1], [], []>} : vector<2x128xf32>, vector<128x384xf32>, vector<2x384xf32> -> vector<2x384xf32>
    %124 = vector.broadcast %4 : vector<1x384xf32> to vector<2x384xf32>
    %125 = arith.addf %123, %124 : vector<2x384xf32>
    %cst_45 = arith.constant dense<0.000000e+00> : vector<2x384xf32>
    %126 = tpu.matmul %84, %3, %cst_45 {dimension_numbers = #tpu.dot_dimension_numbers<[1], [0], [0], [1], [0, 0, 1, 1], [], []>} : vector<2x128xf32>, vector<128x384xf32>, vector<2x384xf32> -> vector<2x384xf32>
    %127 = vector.extract_strided_slice %125 {offsets = [0, 0], sizes = [2, 128], strides = [1, 1]} : vector<2x384xf32> to vector<2x128xf32>
    %128 = vector.extract_strided_slice %126 {offsets = [0, 0], sizes = [2, 128], strides = [1, 1]} : vector<2x384xf32> to vector<2x128xf32>
    %129 = arith.addf %127, %128 : vector<2x128xf32>
    %130 = arith.negf %129 : vector<2x128xf32>
    %131 = math.exp %130 : vector<2x128xf32>
    %cst_46 = arith.constant 1.000000e+00 : f32
    %132 = vector.broadcast %cst_46 : f32 to vector<2x128xf32>
    %133 = arith.addf %132, %131 : vector<2x128xf32>
    %134 = arith.divf %132, %133 : vector<2x128xf32>
    %135 = vector.extract_strided_slice %125 {offsets = [0, 128], sizes = [2, 128], strides = [1, 1]} : vector<2x384xf32> to vector<2x128xf32>
    %136 = vector.extract_strided_slice %126 {offsets = [0, 128], sizes = [2, 128], strides = [1, 1]} : vector<2x384xf32> to vector<2x128xf32>
    %137 = arith.addf %135, %136 : vector<2x128xf32>
    %138 = arith.negf %137 : vector<2x128xf32>
    %139 = math.exp %138 : vector<2x128xf32>
    %cst_47 = arith.constant 1.000000e+00 : f32
    %140 = vector.broadcast %cst_47 : f32 to vector<2x128xf32>
    %141 = arith.addf %140, %139 : vector<2x128xf32>
    %142 = arith.divf %140, %141 : vector<2x128xf32>
    %143 = vector.extract_strided_slice %125 {offsets = [0, 256], sizes = [2, 128], strides = [1, 1]} : vector<2x384xf32> to vector<2x128xf32>
    %144 = vector.extract_strided_slice %126 {offsets = [0, 256], sizes = [2, 128], strides = [1, 1]} : vector<2x384xf32> to vector<2x128xf32>
    %145 = vector.broadcast %5 : vector<1x128xf32> to vector<2x128xf32>
    %146 = arith.addf %144, %145 : vector<2x128xf32>
    %147 = arith.mulf %134, %146 : vector<2x128xf32>
    %148 = arith.addf %143, %147 : vector<2x128xf32>
    %149 = math.tanh %148 : vector<2x128xf32>
    %cst_48 = arith.constant 1.000000e+00 : f32
    %150 = vector.broadcast %cst_48 : f32 to vector<2x128xf32>
    %151 = arith.subf %150, %142 : vector<2x128xf32>
    %152 = arith.mulf %151, %149 : vector<2x128xf32>
    %153 = arith.mulf %142, %84 : vector<2x128xf32>
    %154 = arith.addf %152, %153 : vector<2x128xf32>
    %155 = arith.index_cast %c1_i32 : i32 to index
    %c0_49 = arith.constant 0 : index
    %c0_50 = arith.constant 0 : index
    %156 = vector.load %arg17[%155, %c0_49, %c0_50] : memref<2x2x128xf32, #tpu.memory_space<vmem>>, vector<1x2x128xf32>
    %157 = vector.shape_cast %156 : vector<1x2x128xf32> to vector<2x128xf32>
    %158 = vector.shape_cast %154 : vector<2x128xf32> to vector<1x2x128xf32>
    tpu.vector_store %arg17[%155, %c0_49, %c0_50], %158 {strides = array<i32>} : memref<2x2x128xf32, #tpu.memory_space<vmem>>, vector<1x2x128xf32>,
    %c2_i32 = arith.constant 2 : i32
    %c0_51 = arith.constant 0 : index
    %c0_52 = arith.constant 0 : index
    %c0_53 = arith.constant 0 : index
    %159 = vector.load %arg17[%c0_51, %c0_52, %c0_53] : memref<2x2x128xf32, #tpu.memory_space<vmem>>, vector<2x2x128xf32>
    %160 = vector.extract_strided_slice %159 {offsets = [0, 0, 0], sizes = [2, 1, 128], strides = [1, 1, 1]} : vector<2x2x128xf32> to vector<2x1x128xf32>
    %161 = vector.shape_cast %160 : vector<2x1x128xf32> to vector<2x128xf32>
    %162 = vector.extract_strided_slice %159 {offsets = [0, 1, 0], sizes = [2, 1, 128], strides = [1, 1, 1]} : vector<2x2x128xf32> to vector<2x1x128xf32>
    %163 = vector.shape_cast %162 : vector<2x1x128xf32> to vector<2x128xf32>
    %164 = tpu.concatenate %161, %163 in 0 : vector<2x128xf32>, vector<2x128xf32> -> vector<4x128xf32>
    %c0_54 = arith.constant 0 : index
    %c0_55 = arith.constant 0 : index
    %165 = vector.load %arg10[%c0_54, %c0_55] : memref<128x10xf32, #tpu.memory_space<vmem>>, vector<128x10xf32>
    %cst_56 = arith.constant dense<0.000000e+00> : vector<4x10xf32>
    %166 = tpu.matmul %164, %165, %cst_56 {dimension_numbers = #tpu.dot_dimension_numbers<[1], [0], [0], [1], [0, 0, 1, 1], [], []>} : vector<4x128xf32>, vector<128x10xf32>, vector<4x10xf32> -> vector<4x10xf32>
    %c0_57 = arith.constant 0 : index
    %c0_58 = arith.constant 0 : index
    %167 = vector.load %arg11[%c0_57, %c0_58] : memref<1x10xf32, #tpu.memory_space<vmem>>, vector<1x10xf32>
    %168 = vector.broadcast %167 : vector<1x10xf32> to vector<4x10xf32>
    %169 = arith.addf %166, %168 : vector<4x10xf32>
    %cst_59 = arith.constant 0.000000e+00 : f32
    %170 = vector.broadcast %cst_59 : f32 to vector<4x10xf32>
    %171 = arith.maximumf %169, %170 : vector<4x10xf32>
    %c0_60 = arith.constant 0 : index
    %c0_61 = arith.constant 0 : index
    %172 = vector.load %arg12[%c0_60, %c0_61] : memref<10x1xf32, #tpu.memory_space<vmem>>, vector<10x1xf32>
    %cst_62 = arith.constant dense<0.000000e+00> : vector<4x1xf32>
    %173 = tpu.matmul %171, %172, %cst_62 {dimension_numbers = #tpu.dot_dimension_numbers<[1], [0], [0], [1], [0, 0, 1, 1], [], []>} : vector<4x10xf32>, vector<10x1xf32>, vector<4x1xf32> -> vector<4x1xf32>
    %c0_63 = arith.constant 0 : index
    %c0_64 = arith.constant 0 : index
    %174 = vector.load %arg13[%c0_63, %c0_64] : memref<1x1xf32, #tpu.memory_space<vmem>>, vector<1x1xf32>
    %175 = vector.broadcast %174 : vector<1x1xf32> to vector<4x1xf32>
    %176 = arith.addf %173, %175 : vector<4x1xf32>
    %177 = vector.extract_strided_slice %176 {offsets = [0, 0], sizes = [2, 1], strides = [1, 1]} : vector<4x1xf32> to vector<2x1xf32>
    %178 = vector.extract_strided_slice %176 {offsets = [2, 0], sizes = [2, 1], strides = [1, 1]} : vector<4x1xf32> to vector<2x1xf32>
    %179 = arith.subf %177, %178 : vector<2x1xf32>
    %180 = arith.negf %179 : vector<2x1xf32>
    %181 = math.exp %180 : vector<2x1xf32>
    %cst_65 = arith.constant 1.000000e+00 : f32
    %182 = vector.broadcast %cst_65 : f32 to vector<2x1xf32>
    %183 = arith.addf %182, %181 : vector<2x1xf32>
    %184 = arith.divf %182, %183 : vector<2x1xf32>
    %c0_66 = arith.constant 0 : index
    %c0_67 = arith.constant 0 : index
    %185 = vector.load %arg14[%c0_66, %c0_67] : memref<2x1xf32, #tpu.memory_space<vmem>>, vector<2x1xf32>
    tpu.vector_store %arg14[%c0_66, %c0_67], %184 {strides = array<i32>} : memref<2x1xf32, #tpu.memory_space<vmem>>, vector<2x1xf32>,
    return
  }
}

</mosaic_0001>

<bundles_post_ra>
// kernel: pairwise_forward.1
= control target key start
LH: loop header
LB: loop body
LE: loop exit
PB: predicated region body
PF: predicated region fallthrough
CT: control target
= control target key end

     0   :  { %s2174_s0 = inlined_call_operand.vmem [shape: f32[2,4], index: 0, kind: input, shape index: {}]   ;;  %s2175_s1 = inlined_call_operand.vmem [shape: f32[2,4], index: 1, kind: input, shape index: {}]   ;;  %s2176_s2 = inlined_call_operand.vmem [shape: f32[4,384], index: 2, kind: input, shape index: {}]   ;;  %s2177_s3 = inlined_call_operand.hbm [shape: f32[128,384], index: 3, kind: input, shape index: {}]   ;;  %s2178_s4 = inlined_call_operand.vmem [shape: f32[1,384], index: 4, kind: input, shape index: {}]   ;;  %s2179_s5 = inlined_call_operand.vmem [shape: f32[1,128], index: 5, kind: input, shape index: {}]   ;;  %s2180_s6 = inlined_call_operand.hbm [shape: f32[128,384], index: 6, kind: input, shape index: {}]   ;;  %s2181_s7 = inlined_call_operand.hbm [shape: f32[128,384], index: 7, kind: input, shape index: {}]   ;;  %s2182_s8 = inlined_call_operand.vmem [shape: f32[1,384], index: 8, kind: input, shape index: {}]   ;;  %s2183_s9 = inlined_call_operand.vmem [shape: f32[1,128], index: 9, kind: input, shape index: {}]   ;;  %s2184_s10 = inlined_call_operand.vmem [shape: f32[128,10], index: 10, kind: input, shape index: {}]   ;;  %s2185_s11 = inlined_call_operand.vmem [shape: f32[1,10], index: 11, kind: input, shape index: {}]   ;;  %s2186_s12 = inlined_call_operand.vmem [shape: f32[10,1], index: 12, kind: input, shape index: {}]   ;;  %s2187_s13 = inlined_call_operand.<no memory space> [shape: f32[1,1], index: 13, kind: input, shape index: {}]   ;;  %s2188_s14 = inlined_call_operand.vmem [shape: f32[2,1], index: 14, kind: output, shape index: {}]  }
   0x1   :  { %v19_v0 = vstv %s2187_s13 }
   0x2   :  { %20 = vst [vmem:[#allocation5] sm:$0x1] %v19_v0 }
   0x3   :  { %21 = vsyncpa [#allocation7], 0 }
   0x4   :  { %22 = vsyncpa [#allocation9], 0  ;;  %s50_s17 = sshll.u32 %s2180_s6, 4  ;;  %s1309_s18 = smov [#allocation8]   ;;  %s51_s17 = int_to_ptr.hbm [resolvable:$true] %s50_s17 }
   0x5   :  { %s52_s19 = sshll.u32 %s1309_s18, 4  ;;  %s33_s22 = sshll.u32 %s2177_s3, 4  ;;  %s53_s19 = int_to_ptr.vmem [resolvable:$true] %s52_s19  ;;  %s34_s22 = int_to_ptr.hbm [resolvable:$true] %s33_s22 }
   0x6   :  { %s1310_s23 = smov 384   ;;  %s1311_s24 = smov 24  }
   0x7   :  { %58 = dma.hbm_to_vmem [thread:$0]  %s51_s17, 6144, %s53_s19, [#allocation9], %s1310_s23, %s1310_s23, %s1311_s24  }
   0x8   :  { %s1312_s13 = smov [#allocation6]   ;;  %s63_s28 = sshll.u32 %s2181_s7, 4  ;;  %s64_s28 = int_to_ptr.hbm [resolvable:$true] %s63_s28 }
   0x9   :  { %s35_s25 = sshll.u32 %s1312_s13, 4  ;;  %s1313_s6 = smov [#allocation10]   ;;  %s36_s25 = int_to_ptr.vmem [resolvable:$true] %s35_s25 }
   0xa   :  { %41 = dma.hbm_to_vmem [thread:$0]  %s34_s22, 6144, %s36_s25, [#allocation7], %s1310_s23, %s1310_s23, %s1311_s24  }
   0xb   :  { %s65_s29 = sshll.u32 %s1313_s6, 4  ;;  %s66_s29 = int_to_ptr.vmem [resolvable:$true] %s65_s29 }
   0xc   :  { %71 = dma.hbm_to_vmem [thread:$0]  %s64_s28, 6144, %s66_s29, [#allocation9], %s1310_s23, %s1310_s23, %s1311_s24  }
   0xd   :  { %1305 = dma.done.wait [#allocation7], 6144  }
   0xe   :  { %1306 = vsyncadd [#allocation7], 4294961152 }
   0xf   :  { %1307 = dma.done.wait [#allocation9], 12288  }
  0x10   :  { %1308 = vsyncadd [#allocation9], 4294955008  ;;  %v243_v1 = vld [vmem:[%s2176_s2] sm:$0xff]  ;;  %v244_v2 = vld [vmem:[%s2176_s2 + $0x8] sm:$0xf]  ;;  %vm266_vm0 = vcmask 1043456  }
  0x11   :  { %256 = vst [vmem:[#allocation1] ss:$2 sm:$0xff] %v243_v1  ;;  %v246_v3 = vld [vmem:[%s2174_s0] sm:$0x3]  ;;  %vm262_vm1 = vcmask 31744   ;;  %v1416_v8 = vld [vmem:[#allocation6 + $0x150] sm:$0xff] }
  0x12   :  { %258 = vst [vmem:[#allocation1 + $0x10] ss:$2 sm:$0xff] %v244_v2  ;;  %v1411_v4 = vld [vmem:[#allocation6 + $0x168] sm:$0xff]  ;;  %v1421_v9 = vld [vmem:[#allocation6 + $0x138] sm:$0xff]  ;;  %v1424_v10 = vld [vmem:[#allocation6 + $0x120] sm:$0xff]  ;;  %v2189_v52 = vmov 0.0  }
  0x13   :  { %v1427_v11 = vld [vmem:[#allocation6 + $0x170] sm:$0xff]  ;;  %v1429_v13 = vld [vmem:[#allocation6 + $0x108] sm:$0xff]  ;;  %v1436_v15 = vld [vmem:[#allocation6 + $0x158] sm:$0xff]  ;;  %vm338_vm2 = vcmask 1041408   ;;  %vm444_vm3 = vcmask 1040384  }
  0x14   :  { %v343_v14 = vld [vmem:[%s2175_s1] sm:$0x3]  ;;  %v1440_v17 = vld [vmem:[#allocation6 + $0xf0] sm:$0xff]  ;;  %v1447_v20 = vld [vmem:[#allocation6 + $0xd8] sm:$0xff] }
  0x15   :  { %v1444_v19 = vld [vmem:[#allocation6 + $0x140] sm:$0xff]  ;;  %v1450_v21 = vld [vmem:[#allocation6 + $0x178] sm:$0xff]  ;;  %v1454_v22 = vld [vmem:[#allocation6 + $0x128] sm:$0xff] }
  0x16   :  { %v1457_v23 = vld [vmem:[#allocation6 + $0xc0] sm:$0xff]  ;;  %v1463_v25 = vld [vmem:[#allocation6 + $0x110] sm:$0xff]  ;;  %v1467_v26 = vld [vmem:[#allocation6 + $0xa8] sm:$0xff] }
  0x17   :  { %v1460_v24 = vld [vmem:[#allocation6 + $0x160] sm:$0xff]  ;;  %v1469_v27 = vld [vmem:[#allocation6 + $0x148] sm:$0xff]  ;;  %v1472_v28 = vld [vmem:[#allocation6 + $0xf8] sm:$0xff] }
  0x18   :  { %v259_v5 = vld.sshfl [vmem:[#allocation1] sm:$0xff pattern:$0x75316420]  ;;  %v260_v6 = vld.sshfl [vmem:[#allocation1 + $0x8] sm:$0xff pattern:$0x75316420] }
  0x19   :  { %1156 = vmatpush.msk.msra.mxu1 %vm266_vm0, %v259_v5  ;;  %v261_v7 = vld.sshfl [vmem:[#allocation1 + $0x10] sm:$0xff pattern:$0x75316420]  ;;  %344 = vst [vmem:[#allocation1] ss:$2 sm:$0xff] %v243_v1  ;;  %v1482_v31 = vld [vmem:[#allocation6 + $0xe0] sm:$0xff] }
  0x1a   :  { %1160 = vmatpush.msk.msra.mxu2 %vm266_vm0, %v261_v7  ;;  %346 = vst [vmem:[#allocation1 + $0x10] ss:$2 sm:$0xff] %v244_v2  ;;  %1157 = vmatmul.msk.f32.vlgmr.msra.gmra.mxu1 %vm262_vm1, %v246_v3  ;;  %v1477_v29 = vld [vmem:[#allocation6 + $0x90] sm:$0xff]  ;;  %v1486_v32 = vld [vmem:[#allocation6 + $0x78] sm:$0xff]  ;;  %v1491_v34 = vld [vmem:[#allocation6 + $0xc8] sm:$0xff] }
  0x1b   :  { %1158 = vmatpush.msk.msrb.mxu1 %vm266_vm0, %v260_v6  ;;  %1161 = vmatmul.msk.f32.vlgmr.msra.gmra.mxu2 %vm262_vm1, %v246_v3  ;;  %v1479_v30 = vld [vmem:[#allocation6 + $0x130] sm:$0xff]  ;;  %v1488_v33 = vld [vmem:[#allocation6 + $0x118] sm:$0xff]  ;;  %v1495_v35 = vld [vmem:[#allocation6 + $0x60] sm:$0xff] }
  0x1c   :  { %448 = vmatpush.msrb.mxu2 %v1411_v4  ;;  %2249 = vst [vmem:[#allocation13_spill] sm:$0xff] %v1488_v33  ;;  %v1497_v36 = vld [vmem:[#allocation6 + $0x100] sm:$0xff]  ;;  %v1500_v37 = vld [vmem:[#allocation6 + $0xb0] sm:$0xff]  ;;  %v1504_v38 = vld [vmem:[#allocation6 + $0x48] sm:$0xff] }
  0x1d   :  { %2250 = vst [vmem:[#allocation14_spill] sm:$0xff] %v1497_v36  ;;  %v1506_v39 = vld [vmem:[#allocation6 + $0xe8] sm:$0xff]  ;;  %v1509_v40 = vld [vmem:[#allocation6 + $0x98] sm:$0xff]  ;;  %v1513_v41 = vld [vmem:[#allocation6 + $0x30] sm:$0xff] }
  0x1e   :  { %449 = vmatpush.msrb.mxu2 %v1416_v8  ;;  %2251 = vst [vmem:[#allocation15_spill] sm:$0xff] %v1506_v39  ;;  %v1515_v42 = vld [vmem:[#allocation6 + $0xd0] sm:$0xff]  ;;  %v1518_v43 = vld [vmem:[#allocation6 + $0x80] sm:$0xff]  ;;  %v1522_v44 = vld [vmem:[#allocation6 + $0x18] sm:$0xff] }
  0x1f   :  { %2252 = vst [vmem:[#allocation16_spill] sm:$0xff] %v1515_v42  ;;  %v1524_v45 = vld [vmem:[#allocation6 + $0xb8] sm:$0xff]  ;;  %v1527_v46 = vld [vmem:[#allocation6 + $0x68] sm:$0xff]  ;;  %v1531_v47 = vld [vmem:[#allocation6] sm:$0xff] }
  0x20   :  { %450 = vmatpush.msrb.mxu2 %v1421_v9  ;;  %v347_v12 = vld.sshfl [vmem:[#allocation1] sm:$0xff pattern:$0x75316420]  ;;  %v348_v18 = vld.sshfl [vmem:[#allocation1 + $0x8] sm:$0xff pattern:$0x75316420] }
  0x21   :  { %1162 = vmatpush.msk.msra.mxu3 %vm266_vm0, %v347_v12  ;;  %v349_v16 = vld.sshfl [vmem:[#allocation1 + $0x10] sm:$0xff pattern:$0x75316420]  ;;  %1164 = vmatpush.msk.msra.mxu0 %vm266_vm0, %v348_v18  ;;  %2253 = vst [vmem:[#allocation17_spill] sm:$0xff] %v1524_v45  ;;  %v1533_v48 = vld [vmem:[#allocation6 + $0xa0] sm:$0xff]  ;;  %v1540_v50 = vld [vmem:[#allocation6 + $0x88] sm:$0xff] }
  0x22   :  { %451 = vmatpush.msrb.mxu2 %v1424_v10  ;;  %1159 = vmatmul.msk.f32.vlgmr.msrb.gmra.mxu1 %vm262_vm1, %v246_v3  ;;  %2254 = vst [vmem:[#allocation18_spill] sm:$0xff] %v1533_v48  ;;  %v1536_v49 = vld [vmem:[#allocation6 + $0x50] sm:$0xff]  ;;  %v1543_v51 = vld [vmem:[#allocation6 + $0x38] sm:$0xff]  ;;  %v1550_v54 = vld [vmem:[#allocation6 + $0x20] sm:$0xff] }
  0x23   :  { %468 = vmatpush.msrb.mxu3 %v1427_v11  ;;  %1166 = vmatpush.msk.msra.mxu1 %vm266_vm0, %v349_v16  ;;  %2255 = vst [vmem:[#allocation19_spill] sm:$0xff] %v1540_v50  ;;  %v1548_v53 = vld [vmem:[#allocation6 + $0x70] sm:$0xff]  ;;  %v1554_v55 = vld [vmem:[#allocation6 + $0x58] sm:$0xff]  ;;  %v1556_v56 = vld [vmem:[#allocation6 + $0x8] sm:$0xff] }
  0x24   :  { %452 = vmatpush.msrb.mxu2 %v1429_v13  ;;  %1163 = vmatmul.msk.f32.vlgmr.msra.gmra.mxu3 %vm262_vm1, %v343_v14  ;;  %2256 = vst [vmem:[#allocation20_spill] sm:$0xff] %v1548_v53  ;;  %v1560_v57 = vld [vmem:[#allocation6 + $0x40] sm:$0xff]  ;;  %v1564_v58 = vld [vmem:[#allocation6 + $0x28] sm:$0xff]  ;;  %v1568_v59 = vld [vmem:[#allocation6 + $0x10] sm:$0xff] }
  0x25   :  { %469 = vmatpush.msrb.mxu3 %v1436_v15  ;;  %1165 = vmatmul.msk.f32.vlgmr.msra.gmra.mxu0 %vm262_vm1, %v343_v14  ;;  %2257 = vst [vmem:[#allocation21_spill] sm:$0xff] %v1554_v55  ;;  %v1573_v60 = vld [vmem:[#allocation8 + $0x168] sm:$0xff]  ;;  %v1579_v62 = vld [vmem:[#allocation8 + $0x150] sm:$0xff]  ;;  %v1583_v0 = vld [vmem:[#allocation8 + $0x138] sm:$0xff] }
  0x26   :  { %453 = vmatpush.msrb.mxu2 %v1440_v17  ;;  %488 = vmatpush.msrb.mxu0 %v1450_v21  ;;  %2258 = vst [vmem:[#allocation22_spill] sm:$0xff] %v1560_v57  ;;  %v1575_v61 = vld [vmem:[#allocation10 + $0x168] sm:$0xff]  ;;  %v1581_v63 = vld [vmem:[#allocation10 + $0x150] sm:$0xff]  ;;  %v1585_v1 = vld [vmem:[#allocation10 + $0x138] sm:$0xff] }
  0x27   :  { %470 = vmatpush.msrb.mxu3 %v1444_v19  ;;  %2259 = vst [vmem:[#allocation23_spill] sm:$0xff] %v1564_v58  ;;  %566 = vmatpush.msrb.mxu1 %v1573_v60  ;;  %v1589_v2 = vld [vmem:[#allocation8 + $0x178] sm:$0xff]  ;;  %v1591_v3 = vld [vmem:[#allocation8 + $0x120] sm:$0xff]  ;;  %v1600_v7 = vld [vmem:[#allocation8 + $0x148] sm:$0xff] }
  0x28   :  { %454 = vmatpush.msrb.mxu2 %v1447_v20  ;;  %489 = vmatpush.msrb.mxu0 %v1460_v24  ;;  %2260 = vst [vmem:[#allocation24_spill] sm:$0xff] %v1568_v59  ;;  %v1593_v5 = vld [vmem:[#allocation10 + $0x120] sm:$0xff]  ;;  %v1602_v12 = vld [vmem:[#allocation8 + $0x108] sm:$0xff]  ;;  %v1609_v16 = vld [vmem:[#allocation8 + $0x130] sm:$0xff] }
  0x29   :  { %471 = vmatpush.msrb.mxu3 %v1454_v22  ;;  %2261 = vst [vmem:[#allocation25_spill] sm:$0xff] %v1575_v61  ;;  %567 = vmatpush.msrb.mxu1 %v1579_v62  ;;  %v1596_v6 = vld [vmem:[#allocation8 + $0x160] sm:$0xff]  ;;  %v1611_v18 = vld [vmem:[#allocation8 + $0xf0] sm:$0xff] }
  0x2a   :  { %455 = vmatpush.msrb.mxu2 %v1457_v23  ;;  %1167 = vmatmul.msk.f32.vlgmr.msra.gmra.mxu1 %vm262_vm1, %v343_v14  ;;  %2262 = vst [vmem:[#allocation26_spill] sm:$0xff] %v1581_v63  ;;  %v1604_v14 = vld [vmem:[#allocation10 + $0x108] sm:$0xff] }
  0x2b   :  { %472 = vmatpush.msrb.mxu3 %v1463_v25  ;;  %490 = vmatpush.msrb.mxu0 %v1469_v27  ;;  %2263 = vst [vmem:[#allocation27_spill] sm:$0xff] %v1585_v1 }
  0x2c   :  { %456 = vmatpush.msrb.mxu2 %v1467_v26  ;;  %2264 = vst [vmem:[#allocation28_spill] sm:$0xff] %v1591_v3  ;;  %568 = vmatpush.msrb.mxu1 %v1583_v0 }
  0x2d   :  { %473 = vmatpush.msrb.mxu3 %v1472_v28  ;;  %491 = vmatpush.msrb.mxu0 %v1479_v30  ;;  %2265 = vst [vmem:[#allocation29_spill] sm:$0xff] %v1593_v5 }
  0x2e   :  { %457 = vmatpush.msrb.mxu2 %v1477_v29  ;;  %2266 = vst [vmem:[#allocation30_spill] sm:$0xff] %v1602_v12  ;;  %569 = vmatpush.msrb.mxu1 %v1591_v3 }
  0x2f   :  { %474 = vmatpush.msrb.mxu3 %v1482_v31  ;;  %492 = vmatpush.msrb.mxu0 %v1488_v33  ;;  %2267 = vst [vmem:[#allocation31_spill] sm:$0xff] %v1604_v14 }
  0x30   :  { %458 = vmatpush.msrb.mxu2 %v1486_v32  ;;  %2268 = vst [vmem:[#allocation32_spill] sm:$0xff] %v1611_v18  ;;  %570 = vmatpush.msrb.mxu1 %v1602_v12 }
  0x31   :  { %475 = vmatpush.msrb.mxu3 %v1491_v34  ;;  %493 = vmatpush.msrb.mxu0 %v1497_v36 }
  0x32   :  { %459 = vmatpush.msrb.mxu2 %v1495_v35  ;;  %571 = vmatpush.msrb.mxu1 %v1611_v18 }
  0x33   :  { %476 = vmatpush.msrb.mxu3 %v1500_v37  ;;  %494 = vmatpush.msrb.mxu0 %v1506_v39 }
  0x34   :  { %460 = vmatpush.msrb.mxu2 %v1504_v38 }
  0x35   :  { %477 = vmatpush.msrb.mxu3 %v1509_v40  ;;  %495 = vmatpush.msrb.mxu0 %v1515_v42 }
  0x36   :  { %461 = vmatpush.msrb.mxu2 %v1513_v41 }
  0x37   :  { %478 = vmatpush.msrb.mxu3 %v1518_v43  ;;  %496 = vmatpush.msrb.mxu0 %v1524_v45 }
  0x38   :  { %462 = vmatpush.msrb.mxu2 %v1522_v44 }
  0x39   :  { %479 = vmatpush.msrb.mxu3 %v1527_v46  ;;  %497 = vmatpush.msrb.mxu0 %v1533_v48  ;;  %v1647_v48 = vld [vmem:[#allocation8 + $0x100] sm:$0xff] }
  0x3a   :  { %463 = vmatpush.msrb.mxu2 %v1531_v47 }
  0x3b   :  { %464 = vmatmul.f32.vlgmr.msrb.gmra.mxu2 %v2189_v52  ;;  %480 = vmatpush.msrb.mxu3 %v1536_v49 }
  0x3c   :  { %498 = vmatpush.msrb.mxu0 %v1540_v50  ;;  %v1645_v50 = vld [vmem:[#allocation8 + $0x90] sm:$0xff] }
  0x3d   :  { %481 = vmatpush.msrb.mxu3 %v1543_v51  ;;  %2276 = vst [vmem:[#allocation40_spill] sm:$0xff] %v1645_v50 }
  0x3e   :  { %499 = vmatpush.msrb.mxu0 %v1548_v53  ;;  %v1640_v53 = vld [vmem:[#allocation10 + $0xa8] sm:$0xff] }
  0x3f   :  { %482 = vmatpush.msrb.mxu3 %v1550_v54  ;;  %2275 = vst [vmem:[#allocation39_spill] sm:$0xff] %v1640_v53 }
  0x40   :  { %500 = vmatpush.msrb.mxu0 %v1554_v55  ;;  %v1636_v55 = vld [vmem:[#allocation8 + $0xa8] sm:$0xff] }
  0x41   :  { %483 = vmatpush.msrb.mxu3 %v1556_v56  ;;  %2274 = vst [vmem:[#allocation38_spill] sm:$0xff] %v1636_v55 }
  0x42   :  { %484 = vmatmul.f32.vlgmr.msrb.gmra.mxu3 %v2189_v52  ;;  %501 = vmatpush.msrb.mxu0 %v1560_v57 }
  0x43   :  { %606 = vmatpush.msra.mxu3 %v1589_v2 }
  0x44   :  { %502 = vmatpush.msrb.mxu0 %v1564_v58 }
  0x45   :  { %607 = vmatpush.msra.mxu3 %v1596_v6 }
  0x46   :  { %503 = vmatpush.msrb.mxu0 %v1568_v59  ;;  %v1627_v59 = vld [vmem:[#allocation10 + $0xc0] sm:$0xff] }
  0x47   :  { %504 = vmatmul.f32.vlgmr.msrb.gmra.mxu0 %v2189_v52  ;;  %v1613_v52 = vld [vmem:[#allocation10 + $0xf0] sm:$0xff]  ;;  %608 = vmatpush.msra.mxu3 %v1600_v7  ;;  %2273 = vst [vmem:[#allocation37_spill] sm:$0xff] %v1627_v59 }
  0x48   :  { %626 = vmatpush.msra.mxu0 %v1575_v61  ;;  %2269 = vst [vmem:[#allocation33_spill] sm:$0xff] %v1613_v52 }
  0x49   :  { %609 = vmatpush.msra.mxu3 %v1609_v16 }
  0x4a   :  { %627 = vmatpush.msra.mxu0 %v1581_v63  ;;  %v1620_v63 = vld [vmem:[#allocation10 + $0xd8] sm:$0xff] }
  0x4b   :  { %2271 = vst [vmem:[#allocation35_spill] sm:$0xff] %v1620_v63 }
  0x4c   :  { %628 = vmatpush.msra.mxu0 %v1585_v1  ;;  %v1618_v1 = vld [vmem:[#allocation8 + $0xd8] sm:$0xff] }
  0x4d   :  { %2270 = vst [vmem:[#allocation34_spill] sm:$0xff] %v1618_v1  ;;  %572 = vmatpush.msrb.mxu1 %v1618_v1 }
  0x4e   :  { %629 = vmatpush.msra.mxu0 %v1593_v5  ;;  %v1625_v5 = vld [vmem:[#allocation8 + $0xc0] sm:$0xff] }
  0x4f   :  { %2272 = vst [vmem:[#allocation36_spill] sm:$0xff] %v1625_v5  ;;  %573 = vmatpush.msrb.mxu1 %v1625_v5 }
  0x50   :  { %630 = vmatpush.msra.mxu0 %v1604_v14  ;;  %v245_v14 = vld [vmem:[%s2178_s4] sm:$0x7] }
  0x51   :  { %v249_v58 = vperm.slane %v245_v14, 1  ;;  %v250_v57 = vperm.slane %v245_v14, 2  ;;  %574 = vmatpush.msrb.mxu1 %v1636_v55  ;;  %v1654_v55 = vld [vmem:[#allocation8 + $0x78] sm:$0xff] }
  0x52   :  { %631 = vmatpush.msra.mxu0 %v1613_v52  ;;  %v1638_v52 = vld [vmem:[#allocation8 + $0x118] sm:$0xff]  ;;  %2278 = vst [vmem:[#allocation42_spill] sm:$0xff] %v1654_v55 }
  0x53   :  { %610 = vmatpush.msra.mxu3 %v1638_v52  ;;  %575 = vmatpush.msrb.mxu1 %v1645_v50 }
  0x54   :  { %632 = vmatpush.msra.mxu0 %v1620_v63  ;;  %v248_v63 = vperm.slane %v245_v14, 0  ;;  %v1656_v14 = vld [vmem:[#allocation8 + $0xe8] sm:$0xff] }
  0x55   :  { %611 = vmatpush.msra.mxu3 %v1647_v48  ;;  %576 = vmatpush.msrb.mxu1 %v1654_v55 }
  0x56   :  { %633 = vmatpush.msra.mxu0 %v1627_v59  ;;  %v1649_v59 = vld [vmem:[#allocation10 + $0x90] sm:$0xff] }
  0x57   :  { %2277 = vst [vmem:[#allocation41_spill] sm:$0xff] %v1649_v59  ;;  %612 = vmatpush.msra.mxu3 %v1656_v14 }
  0x58   :  { %634 = vmatpush.msra.mxu0 %v1640_v53  ;;  %v1658_v53 = vld [vmem:[#allocation10 + $0x78] sm:$0xff] }
  0x59   :  { %2279 = vst [vmem:[#allocation43_spill] sm:$0xff] %v1658_v53 }
  0x5a   :  { %635 = vmatpush.msra.mxu0 %v1649_v59  ;;  %v1667_v59 = vld [vmem:[#allocation10 + $0x60] sm:$0xff] }
  0x5b   :  { %2281 = vst [vmem:[#allocation45_spill] sm:$0xff] %v1667_v59 }
  0x5c   :  { %636 = vmatpush.msra.mxu0 %v1658_v53 }
  0x5e   :  { %637 = vmatpush.msra.mxu0 %v1667_v59  ;;  %v1694_v59 = vld [vmem:[#allocation10 + $0x30] sm:$0xff] }
  0x5f   :  { %2285 = vst [vmem:[#allocation49_spill] sm:$0xff] %v1694_v59 }
  0x97   :  { %v290_v61 = vpop.f32.mrf.mxu1 }
  0x98   :  { %v291_v18 = vadd.f32 %v290_v61, %v248_v63  ;;  %v1673_v61 = vld [vmem:[#allocation8 + $0x48] sm:$0xff] }
  0x99   :  { %2282 = vst [vmem:[#allocation46_spill] sm:$0xff] %v1673_v61 }
  0x9e   :  { %v330_v45 = vpop.f32.mrf.mxu2 }
  0x9f   :  { %v310_v5 = vpop.f32.mrf.mxu1  ;;  %v331_v42 = vadd.f32 %v330_v45, %v250_v57  ;;  %v1665_v45 = vld [vmem:[#allocation8 + $0xd0] sm:$0xff] }
  0xa0   :  { %v311_v1 = vadd.f32 %v310_v5, %v249_v58  ;;  %v1663_v5 = vld [vmem:[#allocation8 + $0x60] sm:$0xff]  ;;  %613 = vmatpush.msra.mxu3 %v1665_v45 }
  0xa1   :  { %v337_v50 = vrot.slane %v331_v42, 4  ;;  %2280 = vst [vmem:[#allocation44_spill] sm:$0xff] %v1663_v5  ;;  %577 = vmatpush.msrb.mxu1 %v1663_v5  ;;  %v1675_v42 = vld [vmem:[#allocation8 + $0x170] sm:$0xff]  ;;  %v1682_v5 = vld [vmem:[#allocation10 + $0x48] sm:$0xff] }
  0xa2   :  { %v336_v39 = vrot.slane %v311_v1, 6  ;;  %v396_v12 = vpop.f32.mrf.mxu0  ;;  %v1677_v1 = vld [vmem:[#allocation8 + $0xb8] sm:$0xff]  ;;  %586 = vmatpush.msra.mxu2 %v1675_v42  ;;  %2283 = vst [vmem:[#allocation47_spill] sm:$0xff] %v1682_v5  ;;  %638 = vmatpush.msra.mxu0 %v1682_v5  ;;  %v1700_v5 = vld [vmem:[#allocation8 + $0x140] sm:$0xff] }
  0xa3   :  { %v397_v36 = vadd.f32 %v396_v12, %v249_v58  ;;  %578 = vmatpush.msrb.mxu1 %v1673_v61  ;;  %614 = vmatpush.msra.mxu3 %v1677_v1  ;;  %v1686_v58 = vld [vmem:[#allocation8 + $0x30] sm:$0xff]  ;;  %v1688_v12 = vld [vmem:[#allocation8 + $0x158] sm:$0xff]  ;;  %v1702_v61 = vld [vmem:[#allocation8 + $0x88] sm:$0xff] }
  0xa4   :  { %v339_v55 = vsel %vm338_vm2, %v291_v18, %v336_v39  ;;  %2284 = vst [vmem:[#allocation48_spill] sm:$0xff] %v1686_v58  ;;  %v1690_v18 = vld [vmem:[#allocation8 + $0xa0] sm:$0xff]  ;;  %587 = vmatpush.msra.mxu2 %v1688_v12  ;;  %639 = vmatpush.msra.mxu0 %v1694_v59  ;;  %v1715_v59 = vld [vmem:[#allocation8 + $0x70] sm:$0xff] }
  0xa5   :  { %v340_v53 = vsel %vm266_vm0, %v339_v55, %v337_v50  ;;  %v422_v3 = vrot.slane %v397_v36, 6  ;;  %579 = vmatpush.msrb.mxu1 %v1686_v58  ;;  %615 = vmatpush.msra.mxu3 %v1690_v18  ;;  %v1762_v58 = vld [vmem:[#allocation10 + $0x110] sm:$0xff] }
  0xa6   :  { %342 = vst [vmem:[#allocation2] sm:$0x3f] %v340_v53  ;;  %v1698_v53 = vld [vmem:[#allocation8 + $0x18] sm:$0xff]  ;;  %588 = vmatpush.msra.mxu2 %v1700_v5 }
  0xa7   :  { %v376_v39 = vpop.f32.mrf.mxu3  ;;  %v416_v50 = vpop.f32.mrf.mxu1  ;;  %2286 = vst [vmem:[#allocation50_spill] sm:$0xff] %v1698_v53  ;;  %580 = vmatpush.msrb.mxu1 %v1698_v53  ;;  %616 = vmatpush.msra.mxu3 %v1702_v61  ;;  %v1728_v53 = vld [vmem:[#allocation8 + $0x58] sm:$0xff] }
  0xa8   :  { %v377_v55 = vadd.f32 %v376_v39, %v248_v63  ;;  %v417_v36 = vadd.f32 %v416_v50, %v250_v57  ;;  %v1707_v63 = vld [vmem:[#allocation10 + $0x18] sm:$0xff]  ;;  %v1711_v57 = vld [vmem:[#allocation8] sm:$0xff]  ;;  %v1713_v50 = vld [vmem:[#allocation8 + $0x128] sm:$0xff]  ;;  %2296 = vst [vmem:[#allocation60_spill] sm:$0xff] %v1762_v58 }
  0xa9   :  { %2287 = vst [vmem:[#allocation51_spill] sm:$0xff] %v1707_v63  ;;  %640 = vmatpush.msra.mxu0 %v1707_v63  ;;  %581 = vmatpush.msrb.mxu1 %v1711_v57  ;;  %v1726_v63 = vld [vmem:[#allocation8 + $0x110] sm:$0xff] }
  0xaa   :  { %v424_v33 = vsel %vm338_vm2, %v377_v55, %v422_v3  ;;  %v423_v39 = vrot.slane %v417_v36, 4  ;;  %2288 = vst [vmem:[#allocation52_spill] sm:$0xff] %v1711_v57  ;;  %589 = vmatpush.msra.mxu2 %v1713_v50  ;;  %v1719_v3 = vld [vmem:[#allocation10] sm:$0xff]  ;;  %v1721_v55 = vld [vmem:[#allocation10 + $0x170] sm:$0xff]  ;;  %617 = vmatpush.msra.mxu3 %v1715_v59  ;;  %v1732_v57 = vld [vmem:[#allocation10 + $0x158] sm:$0xff] }
  0xab   :  { %2289 = vst [vmem:[#allocation53_spill] sm:$0xff] %v1719_v3  ;;  %641 = vmatpush.msra.mxu0 %v1719_v3  ;;  %646 = vmatpush.msra.mxu1 %v1721_v55  ;;  %v1742_v3 = vld [vmem:[#allocation10 + $0x140] sm:$0xff] }
  0xac   :  { %2290 = vst [vmem:[#allocation54_spill] sm:$0xff] %v1721_v55  ;;  %v425_v36 = vsel %vm266_vm0, %v424_v33, %v423_v39  ;;  %590 = vmatpush.msra.mxu2 %v1726_v63  ;;  %618 = vmatpush.msra.mxu3 %v1728_v53  ;;  %v1736_v33 = vld [vmem:[#allocation8 + $0xf8] sm:$0xff]  ;;  %v1738_v39 = vld [vmem:[#allocation8 + $0x40] sm:$0xff]  ;;  %v1752_v55 = vld [vmem:[#allocation10 + $0x128] sm:$0xff] }
  0xad   :  { %427 = vst [vmem:[#allocation3] sm:$0x3f] %v425_v36  ;;  %779 = vmatpush.msrb.mxu0 %v1427_v11  ;;  %647 = vmatpush.msra.mxu1 %v1732_v57  ;;  %v1746_v11 = vld [vmem:[#allocation8 + $0xe0] sm:$0xff]  ;;  %v1748_v36 = vld [vmem:[#allocation8 + $0x28] sm:$0xff] }
  0xae   :  { %2291 = vst [vmem:[#allocation55_spill] sm:$0xff] %v1732_v57  ;;  %591 = vmatpush.msra.mxu2 %v1736_v33  ;;  %619 = vmatpush.msra.mxu3 %v1738_v39  ;;  %v1758_v57 = vld [vmem:[#allocation8 + $0x10] sm:$0xff] }
  0xaf   :  { %780 = vmatpush.msrb.mxu0 %v1436_v15  ;;  %2292 = vst [vmem:[#allocation56_spill] sm:$0xff] %v1742_v3  ;;  %648 = vmatpush.msra.mxu1 %v1742_v3  ;;  %v1756_v15 = vld [vmem:[#allocation8 + $0xc8] sm:$0xff]  ;;  %v1770_v3 = vld [vmem:[#allocation10 + $0xf8] sm:$0xff] }
  0xb0   :  { %2293 = vst [vmem:[#allocation57_spill] sm:$0xff] %v1746_v11  ;;  %592 = vmatpush.msra.mxu2 %v1746_v11  ;;  %620 = vmatpush.msra.mxu3 %v1748_v36 }
  0xb1   :  { %781 = vmatpush.msrb.mxu0 %v1444_v19  ;;  %2294 = vst [vmem:[#allocation58_spill] sm:$0xff] %v1752_v55  ;;  %649 = vmatpush.msra.mxu1 %v1752_v55  ;;  %v1766_v19 = vld [vmem:[#allocation8 + $0xb0] sm:$0xff]  ;;  %v1780_v55 = vld [vmem:[#allocation10 + $0xe0] sm:$0xff] }
  0xb2   :  { %2295 = vst [vmem:[#allocation59_spill] sm:$0xff] %v1756_v15  ;;  %593 = vmatpush.msra.mxu2 %v1756_v15  ;;  %621 = vmatpush.msra.mxu3 %v1758_v57  ;;  %v1782_v15 = vld [vmem:[#allocation2] ss:$2 sm:$0x7] }
  0xb3   :  { %782 = vmatpush.msrb.mxu0 %v1454_v22  ;;  %650 = vmatpush.msra.mxu1 %v1762_v58  ;;  %2297 = vst [vmem:[#allocation61_spill] sm:$0xff] %v1770_v3  ;;  %v1776_v22 = vld [vmem:[#allocation8 + $0x98] sm:$0xff]  ;;  %v1807_v58 = vld [vmem:[#allocation8 + $0x50] sm:$0xff] }
  0xb4   :  { %759 = vmatpush.msrb.mxu3 %v1411_v4  ;;  %v1772_v11 = vld [vmem:[#allocation3] ss:$2 sm:$0x7]  ;;  %594 = vmatpush.msra.mxu2 %v1766_v19  ;;  %2298 = vst [vmem:[#allocation62_spill] sm:$0xff] %v1780_v55 }
  0xb5   :  { %783 = vmatpush.msrb.mxu0 %v1463_v25  ;;  %651 = vmatpush.msra.mxu1 %v1770_v3  ;;  %v438_v4 = vperm.slane %v1772_v11, 0  ;;  %v1789_v25 = vld [vmem:[#allocation8 + $0x80] sm:$0xff]  ;;  %v431_v3 = vperm.slane %v1782_v15, 0 }
  0xb6   :  { %760 = vmatpush.msrb.mxu3 %v1416_v8  ;;  %595 = vmatpush.msra.mxu2 %v1776_v22  ;;  %v1793_v8 = vld [vmem:[#allocation10 + $0xc8] sm:$0xff] }
  0xb7   :  { %784 = vmatpush.msrb.mxu0 %v1472_v28  ;;  %652 = vmatpush.msra.mxu1 %v1780_v55  ;;  %2299 = vst [vmem:[#allocation63_spill] sm:$0xff] %v1793_v8  ;;  %v1798_v28 = vld [vmem:[#allocation8 + $0x68] sm:$0xff] }
  0xb8   :  { %761 = vmatpush.msrb.mxu3 %v1421_v9  ;;  %596 = vmatpush.msra.mxu2 %v1789_v25  ;;  %v1802_v9 = vld [vmem:[#allocation10 + $0xb0] sm:$0xff] }
  0xb9   :  { %785 = vmatpush.msrb.mxu0 %v1482_v31  ;;  %653 = vmatpush.msra.mxu1 %v1793_v8  ;;  %v445_v31 = vsel %vm444_vm3, %v431_v3, %v438_v4  ;;  %v439_v4 = vperm.slane %v1772_v11, 1 }
  0xba   :  { %762 = vmatpush.msrb.mxu3 %v1424_v10  ;;  %597 = vmatpush.msra.mxu2 %v1798_v28  ;;  %v1811_v10 = vld [vmem:[#allocation10 + $0x98] sm:$0xff] }
  0xbb   :  { %786 = vmatpush.msrb.mxu0 %v1491_v34  ;;  %654 = vmatpush.msra.mxu1 %v1802_v9  ;;  %v1815_v34 = vld [vmem:[#allocation8 + $0x38] sm:$0xff] }
  0xbc   :  { %763 = vmatpush.msrb.mxu3 %v1429_v13  ;;  %598 = vmatpush.msra.mxu2 %v1807_v58  ;;  %v1820_v13 = vld [vmem:[#allocation10 + $0x80] sm:$0xff] }
  0xbd   :  { %787 = vmatpush.msrb.mxu0 %v1500_v37  ;;  %655 = vmatpush.msra.mxu1 %v1811_v10  ;;  %2300 = vst [vmem:[#allocation64_spill] sm:$0xff] %v1820_v13  ;;  %v1824_v37 = vld [vmem:[#allocation8 + $0x20] sm:$0xff] }
  0xbe   :  { %v465_v55 = vpop.f32.mrf.mxu2  ;;  %764 = vmatpush.msrb.mxu3 %v1440_v17  ;;  %599 = vmatpush.msra.mxu2 %v1815_v34  ;;  %v432_v17 = vperm.slane %v1782_v15, 1 }
  0xbf   :  { %v508_v8 = vadd.f32 %v465_v55, %v445_v31  ;;  %788 = vmatpush.msrb.mxu0 %v1509_v40  ;;  %656 = vmatpush.msra.mxu1 %v1820_v13  ;;  %v1829_v55 = vld [vmem:[#allocation10 + $0x68] sm:$0xff]  ;;  %v1838_v31 = vld [vmem:[#allocation10 + $0x50] sm:$0xff]  ;;  %v2303_v13 = vmov 0.0  }
  0xc0   :  { %765 = vmatpush.msrb.mxu3 %v1447_v20  ;;  %600 = vmatpush.msra.mxu2 %v1824_v37  ;;  %2301 = vst [vmem:[#allocation65_spill] sm:$0xff] %v1829_v55  ;;  %v1833_v40 = vld [vmem:[#allocation8 + $0x8] sm:$0xff] }
  0xc1   :  { %v1168_v3 = vmul.f32 -1.442695, %v508_v8  ;;  %789 = vmatpush.msrb.mxu0 %v1518_v43  ;;  %657 = vmatpush.msra.mxu1 %v1829_v55  ;;  %v446_v8 = vsel %vm444_vm3, %v432_v17, %v439_v4  ;;  %2302 = vst [vmem:[#allocation66_spill] sm:$0xff] %v1838_v31  ;;  %v1840_v43 = vld [vmem:[#allocation10 + $0x178] sm:$0xff]  ;;  %v1848_v4 = vld [vmem:[#allocation10 + $0x160] sm:$0xff] }
  0xc2   :  { %766 = vmatpush.msrb.mxu3 %v1457_v23  ;;  %601 = vmatpush.msra.mxu2 %v1833_v40  ;;  %v1846_v23 = vld [vmem:[#allocation10 + $0x38] sm:$0xff] }
  0xc3   :  { %1189 = vpow2.f32 %v1168_v3  ;;  %790 = vmatpush.msrb.mxu0 %v1527_v46  ;;  %658 = vmatpush.msra.mxu1 %v1838_v31  ;;  %2304 = vst [vmem:[#allocation67_spill] sm:$0xff] %v1846_v23 }
  0xc4   :  { %642 = vmatmul.f32.vlgmr.msra.gmra.mxu0 %v2303_v13  ;;  %666 = vmatpush.msrb.mxu2 %v1840_v43 }
  0xc5   :  { %v485_v20 = vpop.f32.mrf.mxu3  ;;  %767 = vmatpush.msrb.mxu3 %v1467_v26  ;;  %791 = vmatpush.msrb.mxu0 %v1536_v49  ;;  %v1862_v26 = vld [vmem:[#allocation10 + $0x8] sm:$0xff]  ;;  %v1864_v49 = vld [vmem:[#allocation10 + $0x130] sm:$0xff] }
  0xc6   :  { %v528_v3 = vadd.f32 %v485_v20, %v446_v8  ;;  %659 = vmatpush.msra.mxu1 %v1846_v23  ;;  %667 = vmatpush.msrb.mxu2 %v1848_v4  ;;  %v1854_v8 = vld [vmem:[#allocation10 + $0x20] sm:$0xff]  ;;  %v1856_v20 = vld [vmem:[#allocation10 + $0x148] sm:$0xff]  ;;  %2306 = vst [vmem:[#allocation69_spill] sm:$0xff] %v1862_v26 }
  0xc7   :  { %768 = vmatpush.msrb.mxu3 %v1477_v29  ;;  %2305 = vst [vmem:[#allocation68_spill] sm:$0xff] %v1854_v8  ;;  %792 = vmatpush.msrb.mxu0 %v1543_v51  ;;  %v1871_v29 = vld [vmem:[#allocation10 + $0x118] sm:$0xff] }
  0xc8   :  { %v1169_v46 = vmul.f32 -1.442695, %v528_v3  ;;  %660 = vmatpush.msra.mxu1 %v1854_v8  ;;  %668 = vmatpush.msrb.mxu2 %v1856_v20  ;;  %v1910_v8 = vld [vmem:[#allocation10 + $0x88] sm:$0xff] }
  0xc9   :  { %v1190_v17 = vpop.eup %1189  ;;  %769 = vmatpush.msrb.mxu3 %v1486_v32  ;;  %793 = vmatpush.msrb.mxu0 %v1550_v54  ;;  %v1878_v54 = vld [vmem:[#allocation10 + $0x100] sm:$0xff] }
  0xca   :  { %v512_v31 = vadd.f32 1.0, %v1190_v17  ;;  %1191 = vpow2.f32 %v1169_v46  ;;  %661 = vmatpush.msra.mxu1 %v1862_v26  ;;  %669 = vmatpush.msrb.mxu2 %v1864_v49 }
  0xcb   :  { %770 = vmatpush.msrb.mxu3 %v1495_v35  ;;  %794 = vmatpush.msrb.mxu0 %v1556_v56  ;;  %v1884_v56 = vld [vmem:[#allocation10 + $0xe8] sm:$0xff] }
  0xcc   :  { %1193 = vrcp.f32 %v512_v31  ;;  %670 = vmatpush.msrb.mxu2 %v1871_v29  ;;  %v524_v3 = vand.u32 2147483648, %v512_v31  ;;  %v522_v17 = vand.u32 2147483647, %v512_v31  ;;  %vm518_vm5 = vweird.f32 %v512_v31 }
  0xcd   :  { %771 = vmatpush.msrb.mxu3 %v1504_v38  ;;  %907 = vmatpush.msra.mxu0 %v1589_v2  ;;  %v1889_v2 = vld [vmem:[#allocation10 + $0xd0] sm:$0xff] }
  0xce   :  { %671 = vmatpush.msrb.mxu2 %v1878_v54  ;;  %vm523_vm7 = vcmp.eq.f32.partialorder %v522_v17, 8.507059e+37 }
  0xcf   :  { %772 = vmatpush.msrb.mxu3 %v1513_v41  ;;  %908 = vmatpush.msra.mxu0 %v1596_v6  ;;  %v1896_v6 = vld [vmem:[%s2179_s5] ss:$0 sm:$0xff] }
  0xd0   :  { %v1192_v32 = vpop.eup %1191  ;;  %672 = vmatpush.msrb.mxu2 %v1884_v56  ;;  %2307 = vst [vmem:[#allocation70_spill] sm:$0xff] %v1896_v6 }
  0xd1   :  { %v1876_v51 = vadd.f32 1.0, %v1192_v32  ;;  %773 = vmatpush.msrb.mxu3 %v1522_v44  ;;  %909 = vmatpush.msra.mxu0 %v1600_v7  ;;  %v505_v44 = vpop.f32.mrf.mxu0  ;;  %v1899_v7 = vld [vmem:[#allocation10 + $0xb8] sm:$0xff] }
  0xd2   :  { %v1194_v35 = vpop.eup %1193  ;;  %673 = vmatpush.msrb.mxu2 %v1889_v2  ;;  %v551_v26 = vadd.f32 %v1896_v6, %v505_v44 }
  0xd3   :  { %1195 = vrcp.f32 %v1876_v51  ;;  %v514_v38 = vmul.f32 %v1194_v35, %v512_v31  ;;  %774 = vmatpush.msrb.mxu3 %v1531_v47  ;;  %910 = vmatpush.msra.mxu0 %v1609_v16  ;;  %vm519_vm4 = vweird.f32 %v1194_v35  ;;  %v1903_v16 = vld [vmem:[#allocation10 + $0xa0] sm:$0xff]  ;;  %v433_v31 = vperm.slane %v1782_v15, 2 }
  0xd4   :  { %674 = vmatpush.msrb.mxu2 %v1899_v7  ;;  %vm520_vm6 = vmor %vm518_vm5, %vm519_vm4  ;;  %vm538_vm9 = vweird.f32 %v1876_v51 }
  0xd5   :  { %v515_v41 = vsub.f32 1.0, %v514_v38  ;;  %911 = vmatpush.msra.mxu0 %v1638_v52  ;;  %v440_v52 = vperm.slane %v1772_v11, 2 }
  0xd6   :  { %675 = vmatpush.msrb.mxu2 %v1903_v16 }
  0xd7   :  { %v516_v46 = vmul.f32 %v1194_v35, %v515_v41  ;;  %912 = vmatpush.msra.mxu0 %v1647_v48  ;;  %v525_v41 = vor.u32 1.1754944e-38, %v524_v3  ;;  %v544_v48 = vand.u32 2147483648, %v1876_v51  ;;  %v542_v3 = vand.u32 2147483647, %v1876_v51 }
  0xd8   :  { %676 = vmatpush.msrb.mxu2 %v1910_v8 }
  0xd9   :  { %v1196_v47 = vpop.eup %1195  ;;  %v517_v38 = vadd.f32 %v1194_v35, %v516_v46  ;;  %913 = vmatpush.msra.mxu0 %v1656_v14  ;;  %v1916_v46 = vld [vmem:[#allocation10 + $0x70] sm:$0xff]  ;;  %v447_v14 = vsel %vm444_vm3, %v433_v31, %v440_v52  ;;  %vm543_vm11 = vcmp.eq.f32.partialorder %v542_v3, 8.507059e+37  ;;  %v2328_v52 = vld [vmem:[#allocation22_spill] sm:$0xff]  ;;  %v2335_v31 = vld [vmem:[#allocation52_spill] sm:$0xff] }
  0xda   :  { %v534_v32 = vmul.f32 %v1196_v47, %v1876_v51  ;;  %vm539_vm8 = vweird.f32 %v1196_v47  ;;  %677 = vmatpush.msrb.mxu2 %v1916_v46  ;;  %v1935_v51 = vld [vmem:[#allocation10 + $0x10] sm:$0xff]  ;;  %v2340_v3 = vld [vmem:[#allocation56_spill] sm:$0xff] }
  0xdb   :  { %v521_v55 = vsel %vm520_vm6, %v1194_v35, %v517_v38  ;;  %914 = vmatpush.msra.mxu0 %v1665_v45  ;;  %v1922_v35 = vld [vmem:[#allocation10 + $0x58] sm:$0xff]  ;;  %vm540_vm10 = vmor %vm538_vm9, %vm539_vm8  ;;  %v545_v45 = vor.u32 1.1754944e-38, %v544_v48 }
  0xdc   :  { %v535_v23 = vsub.f32 1.0, %v534_v32  ;;  %v526_v44 = vsel %vm523_vm7, %v525_v41, %v521_v55  ;;  %678 = vmatpush.msrb.mxu2 %v1922_v35  ;;  %v1927_v55 = vld [vmem:[#allocation10 + $0x40] sm:$0xff]  ;;  %v1931_v32 = vld [vmem:[#allocation10 + $0x28] sm:$0xff]  ;;  %v2330_v41 = vld [vmem:[#allocation23_spill] sm:$0xff] }
  0xdd   :  { %v552_v6 = vmul.f32 %v551_v26, %v526_v44  ;;  %915 = vmatpush.msra.mxu0 %v1677_v1  ;;  %v2332_v48 = vld [vmem:[#allocation24_spill] sm:$0xff]  ;;  %v2337_v44 = vld [vmem:[#allocation26_spill] sm:$0xff] }
  0xde   :  { %v536_v11 = vmul.f32 %v1196_v47, %v535_v23  ;;  %679 = vmatpush.msrb.mxu2 %v1927_v55 }
  0xdf   :  { %v553_v15 = vadd.f32 %v552_v6, %v447_v14  ;;  %916 = vmatpush.msra.mxu0 %v1690_v18  ;;  %v2342_v14 = vld [vmem:[#allocation58_spill] sm:$0xff] }
  0xe0   :  { %v537_v17 = vadd.f32 %v1196_v47, %v536_v11  ;;  %680 = vmatpush.msrb.mxu2 %v1931_v32  ;;  %v2339_v11 = vld [vmem:[#allocation27_spill] sm:$0xff] }
  0xe1   :  { %1197 = vtanh.f32 %v553_v15  ;;  %917 = vmatpush.msra.mxu0 %v1702_v61  ;;  %v2317_v61 = vld [vmem:[#allocation17_spill] sm:$0xff] }
  0xe2   :  { %v541_v23 = vsel %vm540_vm10, %v1196_v47, %v537_v17  ;;  %681 = vmatpush.msrb.mxu2 %v1935_v51  ;;  %v2344_v17 = vld [vmem:[#allocation60_spill] sm:$0xff]  ;;  %v2346_v15 = vld [vmem:[#allocation61_spill] sm:$0xff] }
  0xe3   :  { %v546_v26 = vsel %vm543_vm11, %v545_v45, %v541_v23  ;;  %918 = vmatpush.msra.mxu0 %v1715_v59  ;;  %v2310_v59 = vld [vmem:[#allocation14_spill] sm:$0xff]  ;;  %v2350_v23 = vld [vmem:[#allocation63_spill] sm:$0xff] }
  0xe4   :  { %v555_v1 = vsub.f32 1.0, %v546_v26  ;;  %v557_v47 = vmul.f32 0.0, %v546_v26  ;;  %v2348_v45 = vld [vmem:[#allocation62_spill] sm:$0xff]  ;;  %v2354_v26 = vld [vmem:[#allocation64_spill] sm:$0xff] }
  0xe5   :  { %919 = vmatpush.msra.mxu0 %v1728_v53  ;;  %v2320_v53 = vld [vmem:[#allocation18_spill] sm:$0xff] }
  0xe7   :  { %v1198_v18 = vpop.eup %1197  ;;  %920 = vmatpush.msra.mxu0 %v1738_v39  ;;  %v2325_v39 = vld [vmem:[#allocation42_spill] sm:$0xff] }
  0xe8   :  { %v556_v6 = vmul.f32 %v1198_v18, %v555_v1  ;;  %v2356_v1 = vld [vmem:[#allocation65_spill] sm:$0xff]  ;;  %v2362_v18 = vld [vmem:[#allocation68_spill] sm:$0xff] }
  0xe9   :  { %921 = vmatpush.msra.mxu0 %v1748_v36  ;;  %v2326_v36 = vld [vmem:[#allocation21_spill] sm:$0xff] }
  0xea   :  { %v1941_v38 = vadd.f32 %v557_v47, %v556_v6  ;;  %v2364_v6 = vld [vmem:[#allocation69_spill] sm:$0xff]  ;;  %v2054_v47 = vld [vmem:[#allocation3 + $0x1] ss:$2 sm:$0x7] }
  0xeb   :  { %922 = vmatpush.msra.mxu0 %v1758_v57  ;;  %v2322_v57 = vld [vmem:[#allocation19_spill] sm:$0xff] }
  0xec   :  { %582 = vmatmul.f32.vlgmr.msrb.gmra.mxu1 %v1941_v38  ;;  %602 = vmatmul.f32.vlgmr.msra.gmra.mxu2 %v1941_v38 }
  0xed   :  { %622 = vmatmul.f32.vlgmr.msra.gmra.mxu3 %v1941_v38  ;;  %795 = vmatmul.f32.vlgmr.msrb.gmra.mxu0 %v1941_v38 }
  0xee   :  { %799 = vmatpush.msrb.mxu1 %v1450_v21  ;;  %867 = vmatpush.msra.mxu2 %v1573_v60  ;;  %v2308_v21 = vld [vmem:[#allocation13_spill] sm:$0xff]  ;;  %v2312_v60 = vld [vmem:[#allocation15_spill] sm:$0xff] }
  0xef   :  { %887 = vmatpush.msra.mxu3 %v1675_v42  ;;  %v2318_v42 = vld [vmem:[#allocation36_spill] sm:$0xff] }
  0xf0   :  { %800 = vmatpush.msrb.mxu1 %v1460_v24  ;;  %868 = vmatpush.msra.mxu2 %v1579_v62  ;;  %v2309_v24 = vld [vmem:[#allocation28_spill] sm:$0xff] }
  0xf1   :  { %888 = vmatpush.msra.mxu3 %v1688_v12  ;;  %v2314_v62 = vld [vmem:[#allocation16_spill] sm:$0xff]  ;;  %v2319_v12 = vld [vmem:[#allocation59_spill] sm:$0xff] }
  0xf2   :  { %801 = vmatpush.msrb.mxu1 %v1469_v27  ;;  %869 = vmatpush.msra.mxu2 %v1583_v0  ;;  %v2311_v27 = vld [vmem:[#allocation30_spill] sm:$0xff] }
  0xf3   :  { %889 = vmatpush.msra.mxu3 %v1700_v5  ;;  %v2315_v0 = vld [vmem:[#allocation34_spill] sm:$0xff]  ;;  %v2316_v5 = vld [vmem:[#allocation57_spill] sm:$0xff] }
  0xf4   :  { %802 = vmatpush.msrb.mxu1 %v1479_v30  ;;  %682 = vmatmul.f32.vlgmr.msrb.gmra.mxu2 %v2303_v13  ;;  %v2313_v30 = vld [vmem:[#allocation32_spill] sm:$0xff] }
  0xf5   :  { %662 = vmatmul.f32.vlgmr.msra.gmra.mxu1 %v2303_v13  ;;  %775 = vmatmul.f32.vlgmr.msrb.gmra.mxu3 %v1941_v38  ;;  %v2327_v13 = vld [vmem:[#allocation44_spill] sm:$0xff] }
  0xf6   :  { %803 = vmatpush.msrb.mxu1 %v2308_v21  ;;  %870 = vmatpush.msra.mxu2 %v2309_v24  ;;  %v2057_v21 = vld [vmem:[#allocation2 + $0x1] ss:$2 sm:$0x7]  ;;  %v751_v24 = vperm.slane %v2054_v47, 1 }
  0xf7   :  { %890 = vmatpush.msra.mxu3 %v1713_v50  ;;  %v2323_v50 = vld [vmem:[#allocation40_spill] sm:$0xff] }
  0xf8   :  { %804 = vmatpush.msrb.mxu1 %v2310_v59  ;;  %871 = vmatpush.msra.mxu2 %v2311_v27 }
  0xf9   :  { %891 = vmatpush.msra.mxu3 %v1726_v63  ;;  %v2321_v63 = vld [vmem:[#allocation38_spill] sm:$0xff] }
  0xfa   :  { %805 = vmatpush.msrb.mxu1 %v2312_v60  ;;  %872 = vmatpush.msra.mxu2 %v2313_v30 }
  0xfb   :  { %892 = vmatpush.msra.mxu3 %v1736_v33  ;;  %v2324_v33 = vld [vmem:[#allocation20_spill] sm:$0xff] }
  0xfc   :  { %806 = vmatpush.msrb.mxu1 %v2314_v62  ;;  %873 = vmatpush.msra.mxu2 %v2315_v0 }
  0xfd   :  { %893 = vmatpush.msra.mxu3 %v2316_v5 }
  0xfe   :  { %807 = vmatpush.msrb.mxu1 %v2317_v61  ;;  %874 = vmatpush.msra.mxu2 %v2318_v42 }
  0xff   :  { %894 = vmatpush.msra.mxu3 %v2319_v12 }
 0x100   :  { %808 = vmatpush.msrb.mxu1 %v2320_v53  ;;  %875 = vmatpush.msra.mxu2 %v2321_v63 }
 0x101   :  { %895 = vmatpush.msra.mxu3 %v1766_v19  ;;  %v2329_v19 = vld [vmem:[#allocation46_spill] sm:$0xff] }
 0x102   :  { %809 = vmatpush.msrb.mxu1 %v2322_v57  ;;  %876 = vmatpush.msra.mxu2 %v2323_v50  ;;  %v750_v50 = vperm.slane %v2054_v47, 0 }
 0x103   :  { %896 = vmatpush.msra.mxu3 %v1776_v22  ;;  %v2331_v22 = vld [vmem:[#allocation48_spill] sm:$0xff] }
 0x104   :  { %810 = vmatpush.msrb.mxu1 %v2324_v33  ;;  %877 = vmatpush.msra.mxu2 %v2325_v39 }
 0x105   :  { %897 = vmatpush.msra.mxu3 %v1789_v25  ;;  %v2333_v25 = vld [vmem:[#allocation50_spill] sm:$0xff] }
 0x106   :  { %811 = vmatpush.msrb.mxu1 %v2326_v36  ;;  %878 = vmatpush.msra.mxu2 %v2327_v13  ;;  %v743_v36 = vperm.slane %v2057_v21, 0 }
 0x107   :  { %898 = vmatpush.msra.mxu3 %v1798_v28  ;;  %v2334_v28 = vld [vmem:[#allocation25_spill] sm:$0xff] }
 0x108   :  { %812 = vmatpush.msrb.mxu1 %v2328_v52  ;;  %879 = vmatpush.msra.mxu2 %v2329_v19  ;;  %v756_v52 = vsel %vm444_vm3, %v743_v36, %v750_v50 }
 0x109   :  { %899 = vmatpush.msra.mxu3 %v1807_v58  ;;  %v2336_v58 = vld [vmem:[#allocation54_spill] sm:$0xff] }
 0x10a   :  { %813 = vmatpush.msrb.mxu1 %v2330_v41  ;;  %880 = vmatpush.msra.mxu2 %v2331_v22 }
 0x10b   :  { %900 = vmatpush.msra.mxu3 %v1815_v34  ;;  %v2338_v34 = vld [vmem:[#allocation55_spill] sm:$0xff] }
 0x10c   :  { %814 = vmatpush.msrb.mxu1 %v2332_v48  ;;  %881 = vmatpush.msra.mxu2 %v2333_v25 }
 0x10d   :  { %815 = vmatmul.f32.vlgmr.msrb.gmra.mxu1 %v1941_v38  ;;  %901 = vmatpush.msra.mxu3 %v1824_v37  ;;  %v2341_v37 = vld [vmem:[#allocation29_spill] sm:$0xff] }
 0x10e   :  { %927 = vmatpush.msra.mxu1 %v2334_v28  ;;  %882 = vmatpush.msra.mxu2 %v2335_v31 }
 0x10f   :  { %902 = vmatpush.msra.mxu3 %v1833_v40  ;;  %v2343_v40 = vld [vmem:[#allocation31_spill] sm:$0xff] }
 0x110   :  { %947 = vmatpush.msrb.mxu2 %v2336_v58  ;;  %928 = vmatpush.msra.mxu1 %v2337_v44 }
 0x111   :  { %967 = vmatpush.msrb.mxu3 %v1840_v43  ;;  %v2345_v43 = vld [vmem:[#allocation33_spill] sm:$0xff] }
 0x112   :  { %948 = vmatpush.msrb.mxu2 %v2338_v34  ;;  %929 = vmatpush.msra.mxu1 %v2339_v11 }
 0x113   :  { %968 = vmatpush.msrb.mxu3 %v1848_v4  ;;  %v2347_v4 = vld [vmem:[#allocation35_spill] sm:$0xff] }
 0x114   :  { %949 = vmatpush.msrb.mxu2 %v2340_v3  ;;  %930 = vmatpush.msra.mxu1 %v2341_v37  ;;  %v2076_v3 = vld [vmem:[%s2183_s9] ss:$0 sm:$0xff] }
 0x115   :  { %969 = vmatpush.msrb.mxu3 %v1856_v20  ;;  %v2349_v20 = vld [vmem:[#allocation37_spill] sm:$0xff] }
 0x116   :  { %950 = vmatpush.msrb.mxu2 %v2342_v14  ;;  %931 = vmatpush.msra.mxu1 %v2343_v40 }
 0x117   :  { %970 = vmatpush.msrb.mxu3 %v1864_v49  ;;  %v2351_v49 = vld [vmem:[#allocation39_spill] sm:$0xff] }
 0x118   :  { %951 = vmatpush.msrb.mxu2 %v2344_v17  ;;  %932 = vmatpush.msra.mxu1 %v2345_v43 }
 0x119   :  { %971 = vmatpush.msrb.mxu3 %v1871_v29  ;;  %v2352_v29 = vld [vmem:[#allocation41_spill] sm:$0xff] }
 0x11a   :  { %952 = vmatpush.msrb.mxu2 %v2346_v15  ;;  %933 = vmatpush.msra.mxu1 %v2347_v4 }
 0x11b   :  { %972 = vmatpush.msrb.mxu3 %v1878_v54  ;;  %v2353_v54 = vld [vmem:[#allocation43_spill] sm:$0xff] }
 0x11c   :  { %953 = vmatpush.msrb.mxu2 %v2348_v45  ;;  %934 = vmatpush.msra.mxu1 %v2349_v20 }
 0x11d   :  { %973 = vmatpush.msrb.mxu3 %v1884_v56  ;;  %v2355_v56 = vld [vmem:[#allocation45_spill] sm:$0xff] }
 0x11e   :  { %954 = vmatpush.msrb.mxu2 %v2350_v23  ;;  %935 = vmatpush.msra.mxu1 %v2351_v49 }
 0x11f   :  { %974 = vmatpush.msrb.mxu3 %v1889_v2  ;;  %v2357_v2 = vld [vmem:[#allocation47_spill] sm:$0xff] }
 0x120   :  { %955 = vmatpush.msrb.mxu2 %v1802_v9  ;;  %936 = vmatpush.msra.mxu1 %v2352_v29  ;;  %v2358_v9 = vld [vmem:[#allocation66_spill] sm:$0xff] }
 0x121   :  { %975 = vmatpush.msrb.mxu3 %v1899_v7  ;;  %v2359_v7 = vld [vmem:[#allocation49_spill] sm:$0xff] }
 0x122   :  { %956 = vmatpush.msrb.mxu2 %v1811_v10  ;;  %937 = vmatpush.msra.mxu1 %v2353_v54  ;;  %v2360_v10 = vld [vmem:[#allocation67_spill] sm:$0xff] }
 0x123   :  { %976 = vmatpush.msrb.mxu3 %v1903_v16  ;;  %v2361_v16 = vld [vmem:[#allocation51_spill] sm:$0xff] }
 0x124   :  { %957 = vmatpush.msrb.mxu2 %v2354_v26  ;;  %938 = vmatpush.msra.mxu1 %v2355_v56 }
 0x125   :  { %977 = vmatpush.msrb.mxu3 %v1910_v8  ;;  %v2363_v8 = vld [vmem:[#allocation53_spill] sm:$0xff] }
 0x126   :  { %958 = vmatpush.msrb.mxu2 %v2356_v1  ;;  %939 = vmatpush.msra.mxu1 %v2357_v2 }
 0x127   :  { %978 = vmatpush.msrb.mxu3 %v1916_v46 }
 0x128   :  { %959 = vmatpush.msrb.mxu2 %v2358_v9  ;;  %940 = vmatpush.msra.mxu1 %v2359_v7 }
 0x129   :  { %979 = vmatpush.msrb.mxu3 %v1922_v35  ;;  %v2052_v35 = vld [vmem:[%s2182_s8] sm:$0x7] }
 0x12a   :  { %960 = vmatpush.msrb.mxu2 %v2360_v10  ;;  %941 = vmatpush.msra.mxu1 %v2361_v16  ;;  %v561_v0 = vperm.slane %v2052_v35, 1  ;;  %v562_v4 = vperm.slane %v2052_v35, 2 }
 0x12b   :  { %980 = vmatpush.msrb.mxu3 %v1927_v55  ;;  %v560_v55 = vperm.slane %v2052_v35, 0 }
 0x12c   :  { %961 = vmatpush.msrb.mxu2 %v2362_v18  ;;  %942 = vmatpush.msra.mxu1 %v2363_v8 }
 0x12d   :  { %981 = vmatpush.msrb.mxu3 %v1931_v32  ;;  %v744_v32 = vperm.slane %v2057_v21, 1 }
 0x12e   :  { %962 = vmatpush.msrb.mxu2 %v2364_v6 }
 0x12f   :  { %982 = vmatpush.msrb.mxu3 %v1935_v51  ;;  %v757_v60 = vsel %vm444_vm3, %v744_v32, %v751_v24 }
 0x141   :  { %v643_v46 = vpop.f32.mrf.mxu0 }
 0x169   :  { %v583_v59 = vpop.f32.mrf.mxu1 }
 0x16a   :  { %v584_v51 = vadd.f32 %v583_v59, %v560_v55  ;;  %v796_v27 = vpop.f32.mrf.mxu0 }
 0x16b   :  { %v839_v62 = vadd.f32 %v796_v27, %v757_v60 }
 0x16c   :  { %v686_v30 = vadd.f32 %v643_v46, %v584_v51 }
 0x16d   :  { %v1173_v42 = vmul.f32 -1.442695, %v839_v62 }
 0x16e   :  { %v1170_v5 = vmul.f32 -1.442695, %v686_v30 }
 0x16f   :  { %v603_v61 = vpop.f32.mrf.mxu2 }
 0x170   :  { %1199 = vpow2.f32 %v1170_v5  ;;  %v604_v12 = vadd.f32 %v603_v61, %v561_v0  ;;  %v623_v53 = vpop.f32.mrf.mxu3 }
 0x171   :  { %1201 = vpow2.f32 %v1173_v42  ;;  %v624_v1 = vadd.f32 %v623_v53, %v562_v4  ;;  %v745_v53 = vperm.slane %v2057_v21, 2 }
 0x172   :  { %v663_v63 = vpop.f32.mrf.mxu1 }
 0x173   :  { %v706_v57 = vadd.f32 %v663_v63, %v604_v12  ;;  %v752_v63 = vperm.slane %v2054_v47, 2 }
 0x175   :  { %v1171_v33 = vmul.f32 -1.442695, %v706_v57  ;;  %v758_v47 = vsel %vm444_vm3, %v745_v53, %v752_v63 }
 0x176   :  { %v1200_v39 = vpop.eup %1199 }
 0x177   :  { %v690_v13 = vadd.f32 1.0, %v1200_v39  ;;  %1203 = vpow2.f32 %v1171_v33  ;;  %v1202_v22 = vpop.eup %1201  ;;  %v683_v14 = vpop.f32.mrf.mxu2  ;;  %v2365_v39 = vld [vmem:[#allocation70_spill] sm:$0xff] }
 0x178   :  { %v776_v19 = vpop.f32.mrf.mxu3  ;;  %v2070_v28 = vadd.f32 1.0, %v1202_v22  ;;  %v729_v49 = vadd.f32 %v2076_v3, %v683_v14 }
 0x179   :  { %1205 = vrcp.f32 %v690_v13  ;;  %v819_v41 = vadd.f32 %v776_v19, %v756_v52  ;;  %v702_v40 = vand.u32 2147483648, %v690_v13  ;;  %v700_v43 = vand.u32 2147483647, %v690_v13 }
 0x17a   :  { %vm696_vm13 = vweird.f32 %v690_v13  ;;  %vm849_vm11 = vweird.f32 %v2070_v28 }
 0x17b   :  { %v1172_v48 = vmul.f32 -1.442695, %v819_v41  ;;  %v703_v29 = vor.u32 1.1754944e-38, %v702_v40  ;;  %vm701_vm15 = vcmp.eq.f32.partialorder %v700_v43, 8.507059e+37 }
 0x17d   :  { %v1204_v25 = vpop.eup %1203  ;;  %1207 = vpow2.f32 %v1172_v48  ;;  %v855_v48 = vand.u32 2147483648, %v2070_v28 }
 0x17e   :  { %v710_v31 = vadd.f32 1.0, %v1204_v25  ;;  %v853_v25 = vand.u32 2147483647, %v2070_v28 }
 0x17f   :  { %v1206_v58 = vpop.eup %1205 }
 0x180   :  { %1209 = vrcp.f32 %v710_v31  ;;  %v692_v44 = vmul.f32 %v1206_v58, %v690_v13  ;;  %vm697_vm12 = vweird.f32 %v1206_v58  ;;  %v722_v7 = vand.u32 2147483648, %v710_v31 }
 0x181   :  { %1211 = vrcp.f32 %v2070_v28  ;;  %vm698_vm14 = vmor %vm696_vm13, %vm697_vm12  ;;  %v720_v18 = vand.u32 2147483647, %v710_v31  ;;  %vm716_vm1 = vweird.f32 %v710_v31  ;;  %vm854_vm13 = vcmp.eq.f32.partialorder %v853_v25, 8.507059e+37 }
 0x182   :  { %v693_v11 = vsub.f32 1.0, %v692_v44  ;;  %v723_v59 = vor.u32 1.1754944e-38, %v722_v7  ;;  %v856_v44 = vor.u32 1.1754944e-38, %v855_v48 }
 0x183   :  { %v1208_v34 = vpop.eup %1207  ;;  %vm721_vm5 = vcmp.eq.f32.partialorder %v720_v18, 8.507059e+37  ;;  %v1058_v18 = vld [vmem:[%s2184_s10 + $0x38] sm:$0xff] }
 0x184   :  { %v823_v37 = vadd.f32 1.0, %v1208_v34  ;;  %v694_v17 = vmul.f32 %v1206_v58, %v693_v11 }
 0x186   :  { %v1210_v15 = vpop.eup %1209  ;;  %1213 = vrcp.f32 %v823_v37  ;;  %v695_v23 = vadd.f32 %v1206_v58, %v694_v17  ;;  %v835_v27 = vand.u32 2147483648, %v823_v37  ;;  %v833_v62 = vand.u32 2147483647, %v823_v37 }
 0x187   :  { %v2079_v45 = vpop.eup %1211  ;;  %v712_v20 = vmul.f32 %v1210_v15, %v710_v31  ;;  %vm717_vm0 = vweird.f32 %v1210_v15  ;;  %vm829_vm7 = vweird.f32 %v823_v37 }
 0x188   :  { %v699_v26 = vsel %vm698_vm14, %v1206_v58, %v695_v23  ;;  %v845_v56 = vmul.f32 %v2079_v45, %v2070_v28  ;;  %vm718_vm4 = vmor %vm716_vm1, %vm717_vm0  ;;  %v836_v57 = vor.u32 1.1754944e-38, %v835_v27  ;;  %vm834_vm9 = vcmp.eq.f32.partialorder %v833_v62, 8.507059e+37  ;;  %v1066_v28 = vld [vmem:[%s2184_s10 + $0x78] sm:$0xff]  ;;  %v1053_v27 = vld [vmem:[%s2184_s10 + $0x10] sm:$0xff] }
 0x189   :  { %v713_v54 = vsub.f32 1.0, %v712_v20  ;;  %v704_v2 = vsel %vm701_vm15, %v703_v29, %v699_v26  ;;  %vm850_vm10 = vweird.f32 %v2079_v45  ;;  %1071 = vmatpush.msrb.mxu0 %v1066_v28  ;;  %v1064_v20 = vld [vmem:[%s2184_s10 + $0x68] sm:$0xff]  ;;  %v1063_v29 = vld [vmem:[%s2184_s10 + $0x60] sm:$0xff]  ;;  %v1062_v26 = vld [vmem:[%s2184_s10 + $0x58] sm:$0xff] }
 0x18a   :  { %v730_v10 = vmul.f32 %v729_v49, %v704_v2  ;;  %v846_v24 = vsub.f32 1.0, %v845_v56  ;;  %v816_v61 = vpop.f32.mrf.mxu1  ;;  %vm851_vm12 = vmor %vm849_vm11, %vm850_vm10 }
 0x18b   :  { %v714_v9 = vmul.f32 %v1210_v15, %v713_v54  ;;  %v859_v36 = vadd.f32 %v2365_v39, %v816_v61  ;;  %v1051_v61 = vld [vmem:[%s2184_s10] sm:$0xff] }
 0x18c   :  { %v1214_v16 = vpop.eup %1213  ;;  %v731_v6 = vadd.f32 %v730_v10, %v624_v1  ;;  %v847_v5 = vmul.f32 %v2079_v45, %v846_v24  ;;  %v1061_v1 = vld [vmem:[%s2184_s10 + $0x50] sm:$0xff]  ;;  %v1059_v10 = vld [vmem:[%s2184_s10 + $0x40] sm:$0xff] }
 0x18d   :  { %v715_v8 = vadd.f32 %v1210_v15, %v714_v9  ;;  %v825_v46 = vmul.f32 %v1214_v16, %v823_v37  ;;  %vm830_vm6 = vweird.f32 %v1214_v16  ;;  %v1060_v9 = vld [vmem:[%s2184_s10 + $0x48] sm:$0xff] }
 0x18e   :  { %1215 = vtanh.f32 %v731_v6  ;;  %vm831_vm8 = vmor %vm829_vm7, %vm830_vm6  ;;  %v848_v41 = vadd.f32 %v2079_v45, %v847_v5  ;;  %v1056_v6 = vld [vmem:[%s2184_s10 + $0x28] sm:$0xff]  ;;  %vm1042_vm7 = vcmask 1041409  }
 0x18f   :  { %v719_v32 = vsel %vm718_vm4, %v1210_v15, %v715_v8  ;;  %v826_v51 = vsub.f32 1.0, %v825_v46  ;;  %v1065_v15 = vld [vmem:[%s2184_s10 + $0x70] sm:$0xff]  ;;  %v1055_v46 = vld [vmem:[%s2184_s10 + $0x20] sm:$0xff] }
 0x190   :  { %v724_v60 = vsel %vm721_vm5, %v723_v59, %v719_v32  ;;  %v852_v58 = vsel %vm851_vm12, %v2079_v45, %v848_v41  ;;  %1072 = vmatpush.msrb.mxu0 %v1065_v15  ;;  %v1057_v8 = vld [vmem:[%s2184_s10 + $0x30] sm:$0xff]  ;;  %v1054_v32 = vld [vmem:[%s2184_s10 + $0x18] sm:$0xff]  ;;  %vm1148_vm12 = vcmask 1024  }
 0x191   :  { %v827_v30 = vmul.f32 %v1214_v16, %v826_v51  ;;  %v733_v12 = vsub.f32 1.0, %v724_v60  ;;  %v735_v19 = vmul.f32 0.0, %v724_v60  ;;  %v857_v34 = vsel %vm854_vm13, %v856_v44, %v852_v58 }
 0x192   :  { %v863_v11 = vsub.f32 1.0, %v857_v34  ;;  %v865_v40 = vmul.f32 %v857_v34, %v1941_v38  ;;  %1073 = vmatpush.msrb.mxu0 %v1064_v20 }
 0x193   :  { %v828_v42 = vadd.f32 %v1214_v16, %v827_v30  ;;  %v1052_v30 = vld [vmem:[%s2184_s10 + $0x8] sm:$0xff] }
 0x194   :  { %v1216_v50 = vpop.eup %1215  ;;  %1074 = vmatpush.msrb.mxu0 %v1063_v29 }
 0x195   :  { %v832_v33 = vsel %vm831_vm8, %v1214_v16, %v828_v42  ;;  %v734_v13 = vmul.f32 %v1216_v50, %v733_v12  ;;  %vm1047_vm8 = vcmask 1043459  }
 0x196   :  { %v837_v52 = vsel %vm834_vm9, %v836_v57, %v832_v33  ;;  %1075 = vmatpush.msrb.mxu0 %v1062_v26  ;;  %v1093_v57 = vld [vmem:[%s2186_s12 + $0x8] sm:$0x3]  ;;  %vm1098_vm9 = vcmask 80896  }
 0x197   :  { %v860_v22 = vmul.f32 %v859_v36, %v837_v52  ;;  %v2095_v21 = vadd.f32 %v735_v19, %v734_v13  ;;  %1176 = vmatpush.msk.msrb.mxu1 %vm338_vm2, %v1093_v57 }
 0x198   :  { %1076 = vmatpush.msrb.mxu0 %v1061_v1 }
 0x199   :  { %v861_v31 = vadd.f32 %v860_v22, %v758_v47  ;;  %737 = vst [vmem:[#allocation4] sm:$0x3] %v2095_v21  ;;  %943 = vmatmul.f32.vlgmr.msra.gmra.mxu1 %v2095_v21 }
 0x19a   :  { %1077 = vmatpush.msrb.mxu0 %v1060_v9 }
 0x19b   :  { %1217 = vtanh.f32 %v861_v31 }
 0x19c   :  { %1078 = vmatpush.msrb.mxu0 %v1059_v10 }
 0x19e   :  { %1079 = vmatpush.msrb.mxu0 %v1058_v18 }
 0x1a0   :  { %1080 = vmatpush.msrb.mxu0 %v1057_v8 }
 0x1a1   :  { %v1218_v37 = vpop.eup %1217 }
 0x1a2   :  { %v864_v14 = vmul.f32 %v1218_v37, %v863_v11  ;;  %1081 = vmatpush.msrb.mxu0 %v1056_v6 }
 0x1a4   :  { %v866_v17 = vadd.f32 %v865_v40, %v864_v14  ;;  %1082 = vmatpush.msrb.mxu0 %v1055_v46 }
 0x1a6   :  { %883 = vmatmul.f32.vlgmr.msra.gmra.mxu2 %v866_v17  ;;  %903 = vmatmul.f32.vlgmr.msra.gmra.mxu3 %v866_v17 }
 0x1a7   :  { %923 = vmatmul.f32.vlgmr.msra.gmra.mxu0 %v866_v17  ;;  %v1037_v17 = vld [vmem:[#allocation4] sm:$0x3] }
 0x1a8   :  { %1083 = vmatpush.msrb.mxu0 %v1054_v32  ;;  %v1045_v15 = vrot.slane %v1037_v17, 7 }
 0x1aa   :  { %1084 = vmatpush.msrb.mxu0 %v1053_v27 }
 0x1ac   :  { %1085 = vmatpush.msrb.mxu0 %v1052_v30 }
 0x1ae   :  { %963 = vmatmul.f32.vlgmr.msrb.gmra.mxu2 %v2095_v21  ;;  %983 = vmatmul.f32.vlgmr.msrb.gmra.mxu3 %v2095_v21 }
 0x1af   :  { %1086 = vmatpush.msrb.mxu0 %v1051_v61 }
 0x216   :  { %v944_v45 = vpop.f32.mrf.mxu1 }
 0x224   :  { %v924_v50 = vpop.f32.mrf.mxu0 }
 0x225   :  { %v925_v41 = vadd.f32 %v924_v50, %v562_v4 }
 0x229   :  { %v884_v43 = vpop.f32.mrf.mxu2  ;;  %v904_v49 = vpop.f32.mrf.mxu3 }
 0x22a   :  { %v885_v38 = vadd.f32 %v884_v43, %v560_v55  ;;  %v905_v55 = vadd.f32 %v904_v49, %v561_v0  ;;  %v1092_v49 = vld [vmem:[%s2186_s12] sm:$0xff] }
 0x22b   :  { %1120 = vmatpush.msrb.mxu1 %v1092_v49 }
 0x22c   :  { %v987_v23 = vadd.f32 %v944_v45, %v885_v38 }
 0x22e   :  { %v1174_v54 = vmul.f32 -1.442695, %v987_v23 }
 0x230   :  { %1219 = vpow2.f32 %v1174_v54 }
 0x231   :  { %v964_v56 = vpop.f32.mrf.mxu2  ;;  %v984_v63 = vpop.f32.mrf.mxu3 }
 0x232   :  { %v1007_v2 = vadd.f32 %v964_v56, %v905_v55  ;;  %v1027_v19 = vadd.f32 %v2076_v3, %v984_v63  ;;  %v1188_v55 = vld [vmem:[#allocation5] ss:$0 sm:$0xff] }
 0x234   :  { %v1175_v7 = vmul.f32 -1.442695, %v1007_v2 }
 0x236   :  { %v1220_v16 = vpop.eup %1219  ;;  %1221 = vpow2.f32 %v1175_v7 }
 0x237   :  { %v991_v0 = vadd.f32 1.0, %v1220_v16 }
 0x239   :  { %1223 = vrcp.f32 %v991_v0  ;;  %v1003_v5 = vand.u32 2147483648, %v991_v0  ;;  %v1001_v12 = vand.u32 2147483647, %v991_v0  ;;  %vm997_vm14 = vweird.f32 %v991_v0 }
 0x23b   :  { %v1004_v36 = vor.u32 1.1754944e-38, %v1003_v5  ;;  %vm1002_vm0 = vcmp.eq.f32.partialorder %v1001_v12, 8.507059e+37 }
 0x23c   :  { %v1222_v24 = vpop.eup %1221 }
 0x23d   :  { %v1011_v59 = vadd.f32 1.0, %v1222_v24 }
 0x23f   :  { %v1224_v51 = vpop.eup %1223  ;;  %1225 = vrcp.f32 %v1011_v59  ;;  %v1023_v47 = vand.u32 2147483648, %v1011_v59  ;;  %v1021_v31 = vand.u32 2147483647, %v1011_v59  ;;  %vm1017_vm4 = vweird.f32 %v1011_v59 }
 0x240   :  { %v993_v60 = vmul.f32 %v1224_v51, %v991_v0  ;;  %vm998_vm3 = vweird.f32 %v1224_v51 }
 0x241   :  { %vm999_vm15 = vmor %vm997_vm14, %vm998_vm3  ;;  %v1024_v34 = vor.u32 1.1754944e-38, %v1023_v47  ;;  %vm1022_vm6 = vcmp.eq.f32.partialorder %v1021_v31, 8.507059e+37 }
 0x242   :  { %v994_v62 = vsub.f32 1.0, %v993_v60 }
 0x244   :  { %v995_v42 = vmul.f32 %v1224_v51, %v994_v62 }
 0x245   :  { %v1226_v53 = vpop.eup %1225 }
 0x246   :  { %v1013_v33 = vmul.f32 %v1226_v53, %v1011_v59  ;;  %v996_v39 = vadd.f32 %v1224_v51, %v995_v42  ;;  %vm1018_vm1 = vweird.f32 %v1226_v53 }
 0x247   :  { %vm1019_vm5 = vmor %vm1017_vm4, %vm1018_vm1 }
 0x248   :  { %v1014_v13 = vsub.f32 1.0, %v1013_v33  ;;  %v1000_v52 = vsel %vm999_vm15, %v1224_v51, %v996_v39 }
 0x249   :  { %v1005_v22 = vsel %vm1002_vm0, %v1004_v36, %v1000_v52 }
 0x24a   :  { %v1015_v48 = vmul.f32 %v1226_v53, %v1014_v13  ;;  %v1028_v25 = vmul.f32 %v1027_v19, %v1005_v22 }
 0x24c   :  { %v1016_v58 = vadd.f32 %v1226_v53, %v1015_v48  ;;  %v1029_v44 = vadd.f32 %v1028_v25, %v925_v41 }
 0x24e   :  { %v1020_v11 = vsel %vm1019_vm5, %v1226_v53, %v1016_v58  ;;  %1227 = vtanh.f32 %v1029_v44 }
 0x24f   :  { %v1025_v37 = vsel %vm1022_vm6, %v1024_v34, %v1020_v11 }
 0x250   :  { %v1031_v14 = vsub.f32 1.0, %v1025_v37  ;;  %v1033_v35 = vmul.f32 %v1025_v37, %v2095_v21  ;;  %v1187_v21 = vld [vmem:[%s2185_s11] ss:$0 sm:$0xff] }
 0x254   :  { %v1228_v3 = vpop.eup %1227 }
 0x255   :  { %v1032_v40 = vmul.f32 %v1228_v3, %v1031_v14 }
 0x257   :  { %v1034_v4 = vadd.f32 %v1033_v35, %v1032_v40 }
 0x259   :  { %1036 = vst [vmem:[#allocation4 + $0x2] sm:$0x3] %v1034_v4 }
 0x260   :  { %v1038_v28 = vld [vmem:[#allocation4 + $0x2] sm:$0x3] }
 0x261   :  { %v1041_v43 = vrot.slane %v1038_v28, 7  ;;  %v1046_v38 = vrot.slane %v1038_v28, 6 }
 0x263   :  { %v1043_v45 = vsel %vm1042_vm7, %v1041_v43, %v1037_v17  ;;  %v1048_v20 = vsel %vm1047_vm8, %v1046_v38, %v1045_v15 }
 0x264   :  { %v1050_v23 = vsel %vm338_vm2, %v1043_v45, %v1048_v20 }
 0x265   :  { %1087 = vmatmul.f32.vlgmr.msrb.gmra.mxu0 %v1050_v23 }
 0x2e2   :  { %v1088_v29 = vpop.f32.mrf.mxu0 }
 0x2e3   :  { %v1089_v54 = vadd.f32 %v1187_v21, %v1088_v29 }
 0x2e5   :  { %v1091_v26 = vmax.f32 %v1089_v54, 0.0 }
 0x2e7   :  { %1177 = vmatmul.msk.f32.vlgmr.msrb.gmra.mxu1 %vm1098_vm9, %v1091_v26 }
 0x364   :  { %v1122_v56 = vpop.f32.mrf.mxu1 }
 0x365   :  { %v1123_v1 = vadd.f32 %v1188_v55, %v1122_v56 }
 0x367   :  { %v1126_v2 = vrot.slane %v1123_v1, 2 }
 0x369   :  { %v1128_v9 = vsub.f32 %v1123_v1, %v1126_v2 }
 0x36b   :  { %v1178_v7 = vmul.f32 -1.442695, %v1128_v9 }
 0x36d   :  { %1229 = vpow2.f32 %v1178_v7 }
 0x373   :  { %v1230_v10 = vpop.eup %1229 }
 0x374   :  { %v1132_v16 = vadd.f32 1.0, %v1230_v10 }
 0x376   :  { %1231 = vrcp.f32 %v1132_v16  ;;  %v1144_v6 = vand.u32 2147483648, %v1132_v16  ;;  %v1142_v24 = vand.u32 2147483647, %v1132_v16  ;;  %vm1138_vm10 = vweird.f32 %v1132_v16 }
 0x378   :  { %v1145_v32 = vor.u32 1.1754944e-38, %v1144_v6  ;;  %vm1143_vm13 = vcmp.eq.f32.partialorder %v1142_v24, 8.507059e+37 }
 0x37c   :  { %v1232_v0 = vpop.eup %1231 }
 0x37d   :  { %v1134_v18 = vmul.f32 %v1232_v0, %v1132_v16  ;;  %vm1139_vm2 = vweird.f32 %v1232_v0 }
 0x37e   :  { %vm1140_vm11 = vmor %vm1138_vm10, %vm1139_vm2 }
 0x37f   :  { %v1135_v8 = vsub.f32 1.0, %v1134_v18 }
 0x381   :  { %v1136_v46 = vmul.f32 %v1232_v0, %v1135_v8 }
 0x383   :  { %v1137_v59 = vadd.f32 %v1232_v0, %v1136_v46 }
 0x385   :  { %v1141_v51 = vsel %vm1140_vm11, %v1232_v0, %v1137_v59 }
 0x386   :  { %v1146_v27 = vsel %vm1143_vm13, %v1145_v32, %v1141_v51 }
 0x387   :  { %1149 = vst.msk [vmem:[%s2188_s14] sm:$0x3] %vm1148_vm12, %v1146_v27 }
 0x388   :  { %1154 = vsyncpa [#allocation7], 1 }
 0x389   :  { %1155 = vsyncpa [#allocation9], 1 }

</bundles_post_ra>
